<compile_context>
chip_gen: v6e
topology: v6e:2x2x1
jax: 0.10.0
libtpu: 0.0.40
codegen_flags: <defaults>
</compile_context>

<pallas_src>
import functools
import math

import jax
import jax.numpy as jnp
from jax.experimental import pallas as pl
from jax.experimental.pallas import tpu as pltpu  # noqa: F401  (TPU backend)


# ----------------------------------------------------------------------------
# The single fused kernel.
# ----------------------------------------------------------------------------
def _net_kernel(x_ref, mask_ref,
                w1s_ref, w1n_ref, b1_ref, xscale_ref,
                w2s_ref, w2n_ref, b2_ref, wz_ref, bz_ref,
                expb_ref, poolb_ref,
                wf1_ref, bf1_ref, wf2_ref, bf2_ref, wf3_ref, bf3_ref,
                out_ref, *, nm1):
    R = x_ref.shape[0]                                   # B * npoints
    big = jnp.float32(1e30)
    mask = mask_ref[...]                                 # (R, R): diag + cross-batch

    # Column-index iota for the per-row argmin (built once, reused 2*(N-1) times).
    colf = jax.lax.broadcasted_iota(jnp.int32, (R, R), 1).astype(jnp.float32)

    def knn_pick(d_work):
        # One-hot of the per-row minimum (ties -> lowest index), plus masked d.
        m = jnp.min(d_work, axis=1, keepdims=True)                       # (R,1)
        cand = d_work <= m
        first = jnp.min(jnp.where(cand, colf, jnp.float32(R)),
                        axis=1, keepdims=True)                           # (R,1)
        oh = (colf == first).astype(jnp.float32)                         # (R,R)
        return oh, d_work + oh * big

    def sel_dist(feat):
        # Selection "distance": sq_j - 2<f_i,f_j> (+mask).  The per-row constant
        # sq_i is dropped -- it cannot change a per-row argmin.
        ones_row = jnp.ones((1, feat.shape[1]), jnp.float32)
        sq_row = jax.lax.dot_general(ones_row, feat * feat,
                                     (((1,), (1,)), ((), ())),
                                     preferred_element_type=jnp.float32)  # (1,R)
        gram = jax.lax.dot_general(feat, feat, (((1,), (1,)), ((), ())),
                                   preferred_element_type=jnp.float32)    # (R,R)
        return sq_row - 2.0 * gram + mask

    # ------------------------- eb1 (first=True) -----------------------------
    x = x_ref[...]                                                        # (R, 2)
    selfp = jnp.dot(x, w1s_ref[...],
                    preferred_element_type=jnp.float32) + b1_ref[...]     # (R, 66)
    nbrp = jnp.dot(x, w1n_ref[...], preferred_element_type=jnp.float32)   # (R, 66)
    dwork = sel_dist(x)
    acc = jnp.zeros_like(selfp)
    for _ in range(nm1):                       # static unroll over N-1 slots
        oh, dwork = knn_pick(dwork)
        acc = acc + jnp.maximum(
            selfp + jnp.dot(oh, nbrp, preferred_element_type=jnp.float32), 0.0)

    # Split meas / vect paths without lane slicing:
    #   x2: meas cols scaled by 1/(N-1), vect cols zeroed (zero-padded eb2
    #       weights make the padding inert, incl. for eb2's distances).
    x2 = acc * xscale_ref[...]                                            # (R, 66)
    #   z1: per-batch mean of the vect cols (pool matrix already holds the
    #       1/((N-1)*P) scale); meas cols hit zero rows of wz below.
    zpool = jnp.dot(poolb_ref[...], acc,
                    preferred_element_type=jnp.float32)                   # (B, 66)
    vz = jnp.dot(zpool, wz_ref[...],
                 preferred_element_type=jnp.float32) + bz_ref[...]        # (B, nm)

    # ------------------- eb2 (vect path only; meas_x discarded) -------------
    self2 = (jnp.dot(x2, w2s_ref[...], preferred_element_type=jnp.float32)
             + b2_ref[...]
             + jnp.dot(expb_ref[...], vz,
                       preferred_element_type=jnp.float32))               # (R, nm)
    nbr2 = jnp.dot(x2, w2n_ref[...], preferred_element_type=jnp.float32)  # (R, nm)
    dwork2 = sel_dist(x2)
    acc2 = jnp.zeros_like(self2)
    for _ in range(nm1):
        oh, dwork2 = knn_pick(dwork2)
        acc2 = acc2 + jnp.maximum(
            self2 + jnp.dot(oh, nbr2, preferred_element_type=jnp.float32), 0.0)
    z2 = jnp.dot(poolb_ref[...], acc2,
                 preferred_element_type=jnp.float32)                      # (B, nm)

    # --------------------------- MLP head ------------------------------------
    # fc1+bn1 folded, relu, dropout=id, fc2+bn2 folded, relu, dropout=id, fc3
    # (padded to 128 lanes), log_softmax(dim=1).
    h = jnp.maximum(jnp.dot(z2, wf1_ref[...],
                            preferred_element_type=jnp.float32) + bf1_ref[...], 0.0)
    h = jnp.maximum(jnp.dot(h, wf2_ref[...],
                            preferred_element_type=jnp.float32) + bf2_ref[...], 0.0)
    logits = jnp.dot(h, wf3_ref[...],
                     preferred_element_type=jnp.float32) + bf3_ref[...]   # (B, 128)
    m = jnp.max(logits, axis=1, keepdims=True)
    s = logits - m
    lse = jnp.log(jnp.sum(jnp.exp(s), axis=1, keepdims=True))
    out_ref[...] = s - lse


# ----------------------------------------------------------------------------
# Wrapper: host-side weight folding / constant construction + the pallas_call.
# (Weight prep is a handful of KB-scale fused XLA ops; in a real deployment it
#  would be hoisted out of the per-step path entirely.)
# ----------------------------------------------------------------------------
def net_forward(x_pts, params, N):
    B, P, d_in = x_pts.shape
    nm1 = N - 1
    R = B * P
    f32 = jnp.float32
    p1, p2, hp = params["eb1"], params["eb2"], params["head"]
    d_out = p1["wmx"].shape[1]          # 50
    nm = p1["wvx"].shape[1]             # nmoments

    # --- constants (pure functions of static shapes -> jit constant-folds) ---
    ridx = jnp.arange(R, dtype=jnp.int32)
    bid = ridx // P
    same = bid[:, None] == bid[None, :]
    diag = ridx[:, None] == ridx[None, :]
    dist_mask = jnp.where(jnp.logical_and(same, jnp.logical_not(diag)),
                          0.0, 1e30).astype(f32)                          # (R, R)
    poolb = (jnp.arange(B, dtype=jnp.int32)[:, None] == bid[None, :]
             ).astype(f32) / float(nm1 * P)                               # (B, R)
    expb = (bid[:, None] == jnp.arange(B, dtype=jnp.int32)[None, :]
            ).astype(f32)                                                 # (R, B)
    xscale = jnp.concatenate([jnp.full((1, d_out), 1.0 / nm1, f32),
                              jnp.zeros((1, nm), f32)], axis=1)           # (1, 66)

    # --- eb1: concat meas/vect outputs, split the [x_i,x_j] matmul, fold z=0 ---
    wc = jnp.concatenate([p1["wmx"], p1["wvx"]], axis=1)                  # (2*d_in, 66)
    w1s, w1n = wc[:d_in], wc[d_in:]
    b1c = jnp.concatenate([p1["bmx"] + p1["bmz"],
                           p1["bvx"] + p1["bvz"]], axis=1)                # (1, 66)

    # --- eb2 (vect only): zero-pad weights to eat the 66-wide x2 slab ---------
    w2s = jnp.concatenate([p2["wvx"][:d_out], jnp.zeros((nm, nm), f32)], axis=0)
    w2n = jnp.concatenate([p2["wvx"][d_out:], jnp.zeros((nm, nm), f32)], axis=0)
    wz = jnp.concatenate([jnp.zeros((d_out, nm), f32), p2["wvz"]], axis=0)

    # --- head: fold eval-mode BN; pad fc3 to 128 lanes (lane-dense store) -----
    eps = 1e-5
    s1 = hp["g1"] * jax.lax.rsqrt(hp["rv1"] + eps)
    s2 = hp["g2"] * jax.lax.rsqrt(hp["rv2"] + eps)
    wf1 = hp["w1"] * s1
    bf1 = hp["b1"] * s1 + hp["bt1"] - hp["rm1"] * s1
    wf2 = hp["w2"] * s2
    bf2 = hp["b2"] * s2 + hp["bt2"] - hp["rm2"] * s2
    ncls = hp["w3"].shape[1]
    pad = 128 - ncls
    wf3 = jnp.concatenate([hp["w3"], jnp.zeros((hp["w3"].shape[0], pad), f32)],
                          axis=1)
    bf3 = jnp.concatenate([hp["b3"], jnp.full((1, pad), -1e30, f32)], axis=1)

    out = pl.pallas_call(
        functools.partial(_net_kernel, nm1=nm1),
        out_shape=jax.ShapeDtypeStruct((B, 128), f32),
    )(x_pts.reshape(R, d_in), dist_mask,
      w1s, w1n, b1c, xscale,
      w2s, w2n, p2["bvx"], wz, p2["bvz"],
      expb, poolb,
      wf1, bf1, wf2, bf2, wf3, bf3)
    return out[:, :ncls]


# ----------------------------------------------------------------------------
# Deterministic parameter initialization (mimics nn.Linear's U(-1/sqrt(in), .)).
# Weights stored transposed as (in, out); biases / BN params as (1, out).
# ----------------------------------------------------------------------------
def _linear(key, fan_in, fan_out):
    k1, k2 = jax.random.split(key)
    bound = 1.0 / math.sqrt(fan_in)
    w = jax.random.uniform(k1, (fan_in, fan_out), jnp.float32, -bound, bound)
    b = jax.random.uniform(k2, (1, fan_out), jnp.float32, -bound, bound)
    return w, b


def _eb_params(key, d, d_out, nm, dz):
    ks = jax.random.split(key, 4)
    wmx, bmx = _linear(ks[0], 2 * d, d_out)
    wvx, bvx = _linear(ks[1], 2 * d, nm)
    wmz, bmz = _linear(ks[2], dz, d_out)
    wvz, bvz = _linear(ks[3], dz, nm)
    return dict(wmx=wmx, bmx=bmx, wvx=wvx, bvx=bvx,
                wmz=wmz, bmz=bmz, wvz=wvz, bvz=bvz)


def _head_params(key, nm, h1, h2):
    ks = jax.random.split(key, 7)
    w1, b1 = _linear(ks[0], nm, h1)
    w2, b2 = _linear(ks[1], h1, h2)
    w3, b3 = _linear(ks[2], h2, 10)
    g1 = 1.0 + 0.1 * jax.random.normal(ks[3], (1, h1), jnp.float32)
    bt1 = 0.1 * jax.random.normal(ks[4], (1, h1), jnp.float32)
    g2 = 1.0 + 0.1 * jax.random.normal(ks[5], (1, h2), jnp.float32)
    bt2 = 0.1 * jax.random.normal(ks[6], (1, h2), jnp.float32)
    return dict(w1=w1, b1=b1, w2=w2, b2=b2, w3=w3, b3=b3,
                g1=g1, bt1=bt1, rm1=jnp.zeros((1, h1), jnp.float32),
                rv1=jnp.ones((1, h1), jnp.float32),
                g2=g2, bt2=bt2, rm2=jnp.zeros((1, h2), jnp.float32),
                rv2=jnp.ones((1, h2), jnp.float32))


def init_params(key, nmoments, hidden, hidden2):
    k1, k2, k3 = jax.random.split(key, 3)
    return dict(
        eb1=_eb_params(k1, d=2, d_out=50, nm=nmoments, dz=1),        # first=True
        eb2=_eb_params(k2, d=50, d_out=1, nm=nmoments, dz=nmoments),
        head=_head_params(k3, nmoments, hidden, hidden2),
    )


if __name__ == "__main__":
    # Small shapes: batch=4, npoints=8, d=2, N=4 neighbors, nmoments=16,
    # hidden_dim=32, hidden_dim2=32.
    B, NPOINTS, N, NMOMENTS, H1, H2 = 4, 8, 4, 16, 32, 32

    key = jax.random.PRNGKey(0)
    params = init_params(key, NMOMENTS, H1, H2)
    x = jax.random.normal(jax.random.fold_in(key, 123), (B, NPOINTS, 2),
                          dtype=jnp.float32)

    fwd = jax.jit(functools.partial(net_forward, N=N))
    out = fwd(x, params)
    jax.block_until_ready(out)

    assert out.shape == (B, 10) and out.dtype == jnp.float32
    assert bool(jnp.all(jnp.isfinite(out)))
    # log_softmax self-consistency: each row must exponentiate to a prob. simplex.
    assert bool(jnp.all(jnp.abs(jnp.sum(jnp.exp(out), axis=1) - 1.0) < 1e-4))
    print("KERNEL_OK")
</pallas_src>

<mosaic_0001>
module attributes {stable_mosaic.version = 11 : i64} {
  func.func @_net_kernel(%arg0: memref<32x2xf32, #tpu.memory_space<vmem>>, %arg1: memref<32x32xf32, #tpu.memory_space<vmem>>, %arg2: memref<2x66xf32, #tpu.memory_space<vmem>>, %arg3: memref<2x66xf32, #tpu.memory_space<vmem>>, %arg4: memref<1x66xf32, #tpu.memory_space<vmem>>, %arg5: memref<1x66xf32, #tpu.memory_space<vmem>>, %arg6: memref<66x16xf32, #tpu.memory_space<vmem>>, %arg7: memref<66x16xf32, #tpu.memory_space<vmem>>, %arg8: memref<1x16xf32, #tpu.memory_space<vmem>>, %arg9: memref<66x16xf32, #tpu.memory_space<vmem>>, %arg10: memref<1x16xf32, #tpu.memory_space<vmem>>, %arg11: memref<32x4xf32, #tpu.memory_space<vmem>>, %arg12: memref<4x32xf32, #tpu.memory_space<vmem>>, %arg13: memref<16x32xf32, #tpu.memory_space<vmem>>, %arg14: memref<1x32xf32, #tpu.memory_space<vmem>>, %arg15: memref<32x32xf32, #tpu.memory_space<vmem>>, %arg16: memref<1x32xf32, #tpu.memory_space<vmem>>, %arg17: memref<32x128xf32, #tpu.memory_space<vmem>>, %arg18: memref<1x128xf32, #tpu.memory_space<vmem>>, %arg19: memref<4x128xf32, #tpu.memory_space<vmem>>) attributes {dimension_semantics = [], scalar_prefetch = 0 : i64, scratch_operands = 0 : i64, tpu.core_type = #tpu.core_type<tc>} {
    %c0 = arith.constant 0 : index
    %c0_0 = arith.constant 0 : index
    %0 = vector.load %arg1[%c0, %c0_0] : memref<32x32xf32, #tpu.memory_space<vmem>>, vector<32x32xf32>
    %1 = tpu.iota {dimensions = array<i32: 1>} : vector<32x32xi32>
    %2 = arith.sitofp %1 : vector<32x32xi32> to vector<32x32xf32>
    %c0_1 = arith.constant 0 : index
    %c0_2 = arith.constant 0 : index
    %3 = vector.load %arg0[%c0_1, %c0_2] : memref<32x2xf32, #tpu.memory_space<vmem>>, vector<32x2xf32>
    %c0_3 = arith.constant 0 : index
    %c0_4 = arith.constant 0 : index
    %4 = vector.load %arg2[%c0_3, %c0_4] : memref<2x66xf32, #tpu.memory_space<vmem>>, vector<2x66xf32>
    %cst = arith.constant dense<0.000000e+00> : vector<32x66xf32>
    %5 = tpu.matmul %3, %4, %cst {dimension_numbers = #tpu.dot_dimension_numbers<[1], [0], [0], [1], [0, 0, 1, 1], [], []>} : vector<32x2xf32>, vector<2x66xf32>, vector<32x66xf32> -> vector<32x66xf32>
    %c0_5 = arith.constant 0 : index
    %c0_6 = arith.constant 0 : index
    %6 = vector.load %arg4[%c0_5, %c0_6] : memref<1x66xf32, #tpu.memory_space<vmem>>, vector<1x66xf32>
    %7 = vector.broadcast %6 : vector<1x66xf32> to vector<32x66xf32>
    %8 = arith.addf %5, %7 : vector<32x66xf32>
    %c0_7 = arith.constant 0 : index
    %c0_8 = arith.constant 0 : index
    %9 = vector.load %arg3[%c0_7, %c0_8] : memref<2x66xf32, #tpu.memory_space<vmem>>, vector<2x66xf32>
    %cst_9 = arith.constant dense<0.000000e+00> : vector<32x66xf32>
    %10 = tpu.matmul %3, %9, %cst_9 {dimension_numbers = #tpu.dot_dimension_numbers<[1], [0], [0], [1], [0, 0, 1, 1], [], []>} : vector<32x2xf32>, vector<2x66xf32>, vector<32x66xf32> -> vector<32x66xf32>
    %cst_10 = arith.constant 1.000000e+00 : f32
    %11 = vector.broadcast %cst_10 : f32 to vector<1x2xf32>
    %12 = arith.mulf %3, %3 : vector<32x2xf32>
    %cst_11 = arith.constant dense<0.000000e+00> : vector<1x32xf32>
    %13 = tpu.matmul %11, %12, %cst_11 {dimension_numbers = #tpu.dot_dimension_numbers<[1], [1], [0], [0], [0, 0, 1, 0], [], []>} : vector<1x2xf32>, vector<32x2xf32>, vector<1x32xf32> -> vector<1x32xf32>
    %cst_12 = arith.constant dense<0.000000e+00> : vector<32x32xf32>
    %14 = tpu.matmul %3, %3, %cst_12 {dimension_numbers = #tpu.dot_dimension_numbers<[1], [1], [0], [0], [0, 0, 1, 0], [], []>} : vector<32x2xf32>, vector<32x2xf32>, vector<32x32xf32> -> vector<32x32xf32>
    %cst_13 = arith.constant 2.000000e+00 : f32
    %15 = vector.broadcast %cst_13 : f32 to vector<32x32xf32>
    %16 = arith.mulf %15, %14 : vector<32x32xf32>
    %17 = vector.broadcast %13 : vector<1x32xf32> to vector<32x32xf32>
    %18 = arith.subf %17, %16 : vector<32x32xf32>
    %19 = arith.addf %18, %0 : vector<32x32xf32>
    %cst_14 = arith.constant 0.000000e+00 : f32
    %20 = vector.broadcast %cst_14 : f32 to vector<32x66xf32>
    %cst_15 = arith.constant dense<0x7F800000> : vector<32xf32>
    %21 = vector.multi_reduction <minimumf>, %19, %cst_15 [1] : vector<32x32xf32> to vector<32xf32>
    %22 = vector.shape_cast %21 : vector<32xf32> to vector<32x1xf32>
    %23 = vector.broadcast %22 : vector<32x1xf32> to vector<32x32xf32>
    %24 = arith.cmpf ole, %19, %23 : vector<32x32xf32>
    %cst_16 = arith.constant 3.200000e+01 : f32
    %25 = vector.broadcast %cst_16 : f32 to vector<32x32xf32>
    %26 = arith.select %24, %2, %25 : vector<32x32xi1>, vector<32x32xf32>
    %cst_17 = arith.constant dense<0x7F800000> : vector<32xf32>
    %27 = vector.multi_reduction <minimumf>, %26, %cst_17 [1] : vector<32x32xf32> to vector<32xf32>
    %28 = vector.shape_cast %27 : vector<32xf32> to vector<32x1xf32>
    %29 = vector.broadcast %28 : vector<32x1xf32> to vector<32x32xf32>
    %30 = arith.cmpf oeq, %2, %29 : vector<32x32xf32>
    %31 = arith.extui %30 : vector<32x32xi1> to vector<32x32xi32>
    %32 = arith.sitofp %31 : vector<32x32xi32> to vector<32x32xf32>
    %cst_18 = arith.constant 1.000000e+30 : f32
    %33 = vector.broadcast %cst_18 : f32 to vector<32x32xf32>
    %34 = arith.mulf %32, %33 : vector<32x32xf32>
    %35 = arith.addf %19, %34 : vector<32x32xf32>
    %cst_19 = arith.constant dense<0.000000e+00> : vector<32x66xf32>
    %36 = tpu.matmul %32, %10, %cst_19 {dimension_numbers = #tpu.dot_dimension_numbers<[1], [0], [0], [1], [0, 0, 1, 1], [], []>} : vector<32x32xf32>, vector<32x66xf32>, vector<32x66xf32> -> vector<32x66xf32>
    %37 = arith.addf %8, %36 : vector<32x66xf32>
    %cst_20 = arith.constant 0.000000e+00 : f32
    %38 = vector.broadcast %cst_20 : f32 to vector<32x66xf32>
    %39 = arith.maximumf %37, %38 : vector<32x66xf32>
    %40 = arith.addf %20, %39 : vector<32x66xf32>
    %cst_21 = arith.constant dense<0x7F800000> : vector<32xf32>
    %41 = vector.multi_reduction <minimumf>, %35, %cst_21 [1] : vector<32x32xf32> to vector<32xf32>
    %42 = vector.shape_cast %41 : vector<32xf32> to vector<32x1xf32>
    %43 = vector.broadcast %42 : vector<32x1xf32> to vector<32x32xf32>
    %44 = arith.cmpf ole, %35, %43 : vector<32x32xf32>
    %cst_22 = arith.constant 3.200000e+01 : f32
    %45 = vector.broadcast %cst_22 : f32 to vector<32x32xf32>
    %46 = arith.select %44, %2, %45 : vector<32x32xi1>, vector<32x32xf32>
    %cst_23 = arith.constant dense<0x7F800000> : vector<32xf32>
    %47 = vector.multi_reduction <minimumf>, %46, %cst_23 [1] : vector<32x32xf32> to vector<32xf32>
    %48 = vector.shape_cast %47 : vector<32xf32> to vector<32x1xf32>
    %49 = vector.broadcast %48 : vector<32x1xf32> to vector<32x32xf32>
    %50 = arith.cmpf oeq, %2, %49 : vector<32x32xf32>
    %51 = arith.extui %50 : vector<32x32xi1> to vector<32x32xi32>
    %52 = arith.sitofp %51 : vector<32x32xi32> to vector<32x32xf32>
    %cst_24 = arith.constant 1.000000e+30 : f32
    %53 = vector.broadcast %cst_24 : f32 to vector<32x32xf32>
    %54 = arith.mulf %52, %53 : vector<32x32xf32>
    %55 = arith.addf %35, %54 : vector<32x32xf32>
    %cst_25 = arith.constant dense<0.000000e+00> : vector<32x66xf32>
    %56 = tpu.matmul %52, %10, %cst_25 {dimension_numbers = #tpu.dot_dimension_numbers<[1], [0], [0], [1], [0, 0, 1, 1], [], []>} : vector<32x32xf32>, vector<32x66xf32>, vector<32x66xf32> -> vector<32x66xf32>
    %57 = arith.addf %8, %56 : vector<32x66xf32>
    %cst_26 = arith.constant 0.000000e+00 : f32
    %58 = vector.broadcast %cst_26 : f32 to vector<32x66xf32>
    %59 = arith.maximumf %57, %58 : vector<32x66xf32>
    %60 = arith.addf %40, %59 : vector<32x66xf32>
    %cst_27 = arith.constant dense<0x7F800000> : vector<32xf32>
    %61 = vector.multi_reduction <minimumf>, %55, %cst_27 [1] : vector<32x32xf32> to vector<32xf32>
    %62 = vector.shape_cast %61 : vector<32xf32> to vector<32x1xf32>
    %63 = vector.broadcast %62 : vector<32x1xf32> to vector<32x32xf32>
    %64 = arith.cmpf ole, %55, %63 : vector<32x32xf32>
    %cst_28 = arith.constant 3.200000e+01 : f32
    %65 = vector.broadcast %cst_28 : f32 to vector<32x32xf32>
    %66 = arith.select %64, %2, %65 : vector<32x32xi1>, vector<32x32xf32>
    %cst_29 = arith.constant dense<0x7F800000> : vector<32xf32>
    %67 = vector.multi_reduction <minimumf>, %66, %cst_29 [1] : vector<32x32xf32> to vector<32xf32>
    %68 = vector.shape_cast %67 : vector<32xf32> to vector<32x1xf32>
    %69 = vector.broadcast %68 : vector<32x1xf32> to vector<32x32xf32>
    %70 = arith.cmpf oeq, %2, %69 : vector<32x32xf32>
    %71 = arith.extui %70 : vector<32x32xi1> to vector<32x32xi32>
    %72 = arith.sitofp %71 : vector<32x32xi32> to vector<32x32xf32>
    %cst_30 = arith.constant dense<0.000000e+00> : vector<32x66xf32>
    %73 = tpu.matmul %72, %10, %cst_30 {dimension_numbers = #tpu.dot_dimension_numbers<[1], [0], [0], [1], [0, 0, 1, 1], [], []>} : vector<32x32xf32>, vector<32x66xf32>, vector<32x66xf32> -> vector<32x66xf32>
    %74 = arith.addf %8, %73 : vector<32x66xf32>
    %cst_31 = arith.constant 0.000000e+00 : f32
    %75 = vector.broadcast %cst_31 : f32 to vector<32x66xf32>
    %76 = arith.maximumf %74, %75 : vector<32x66xf32>
    %77 = arith.addf %60, %76 : vector<32x66xf32>
    %c0_32 = arith.constant 0 : index
    %c0_33 = arith.constant 0 : index
    %78 = vector.load %arg5[%c0_32, %c0_33] : memref<1x66xf32, #tpu.memory_space<vmem>>, vector<1x66xf32>
    %79 = vector.broadcast %78 : vector<1x66xf32> to vector<32x66xf32>
    %80 = arith.mulf %77, %79 : vector<32x66xf32>
    %c0_34 = arith.constant 0 : index
    %c0_35 = arith.constant 0 : index
    %81 = vector.load %arg12[%c0_34, %c0_35] : memref<4x32xf32, #tpu.memory_space<vmem>>, vector<4x32xf32>
    %cst_36 = arith.constant dense<0.000000e+00> : vector<4x66xf32>
    %82 = tpu.matmul %81, %77, %cst_36 {dimension_numbers = #tpu.dot_dimension_numbers<[1], [0], [0], [1], [0, 0, 1, 1], [], []>} : vector<4x32xf32>, vector<32x66xf32>, vector<4x66xf32> -> vector<4x66xf32>
    %c0_37 = arith.constant 0 : index
    %c0_38 = arith.constant 0 : index
    %83 = vector.load %arg9[%c0_37, %c0_38] : memref<66x16xf32, #tpu.memory_space<vmem>>, vector<66x16xf32>
    %cst_39 = arith.constant dense<0.000000e+00> : vector<4x16xf32>
    %84 = tpu.matmul %82, %83, %cst_39 {dimension_numbers = #tpu.dot_dimension_numbers<[1], [0], [0], [1], [0, 0, 1, 1], [], []>} : vector<4x66xf32>, vector<66x16xf32>, vector<4x16xf32> -> vector<4x16xf32>
    %c0_40 = arith.constant 0 : index
    %c0_41 = arith.constant 0 : index
    %85 = vector.load %arg10[%c0_40, %c0_41] : memref<1x16xf32, #tpu.memory_space<vmem>>, vector<1x16xf32>
    %86 = vector.broadcast %85 : vector<1x16xf32> to vector<4x16xf32>
    %87 = arith.addf %84, %86 : vector<4x16xf32>
    %c0_42 = arith.constant 0 : index
    %c0_43 = arith.constant 0 : index
    %88 = vector.load %arg6[%c0_42, %c0_43] : memref<66x16xf32, #tpu.memory_space<vmem>>, vector<66x16xf32>
    %cst_44 = arith.constant dense<0.000000e+00> : vector<32x16xf32>
    %89 = tpu.matmul %80, %88, %cst_44 {dimension_numbers = #tpu.dot_dimension_numbers<[1], [0], [0], [1], [0, 0, 1, 1], [], []>} : vector<32x66xf32>, vector<66x16xf32>, vector<32x16xf32> -> vector<32x16xf32>
    %c0_45 = arith.constant 0 : index
    %c0_46 = arith.constant 0 : index
    %90 = vector.load %arg8[%c0_45, %c0_46] : memref<1x16xf32, #tpu.memory_space<vmem>>, vector<1x16xf32>
    %91 = vector.broadcast %90 : vector<1x16xf32> to vector<32x16xf32>
    %92 = arith.addf %89, %91 : vector<32x16xf32>
    %c0_47 = arith.constant 0 : index
    %c0_48 = arith.constant 0 : index
    %93 = vector.load %arg11[%c0_47, %c0_48] : memref<32x4xf32, #tpu.memory_space<vmem>>, vector<32x4xf32>
    %cst_49 = arith.constant dense<0.000000e+00> : vector<32x16xf32>
    %94 = tpu.matmul %93, %87, %cst_49 {dimension_numbers = #tpu.dot_dimension_numbers<[1], [0], [0], [1], [0, 0, 1, 1], [], []>} : vector<32x4xf32>, vector<4x16xf32>, vector<32x16xf32> -> vector<32x16xf32>
    %95 = arith.addf %92, %94 : vector<32x16xf32>
    %c0_50 = arith.constant 0 : index
    %c0_51 = arith.constant 0 : index
    %96 = vector.load %arg7[%c0_50, %c0_51] : memref<66x16xf32, #tpu.memory_space<vmem>>, vector<66x16xf32>
    %cst_52 = arith.constant dense<0.000000e+00> : vector<32x16xf32>
    %97 = tpu.matmul %80, %96, %cst_52 {dimension_numbers = #tpu.dot_dimension_numbers<[1], [0], [0], [1], [0, 0, 1, 1], [], []>} : vector<32x66xf32>, vector<66x16xf32>, vector<32x16xf32> -> vector<32x16xf32>
    %cst_53 = arith.constant 1.000000e+00 : f32
    %98 = vector.broadcast %cst_53 : f32 to vector<1x66xf32>
    %99 = arith.mulf %80, %80 : vector<32x66xf32>
    %cst_54 = arith.constant dense<0.000000e+00> : vector<1x32xf32>
    %100 = tpu.matmul %98, %99, %cst_54 {dimension_numbers = #tpu.dot_dimension_numbers<[1], [1], [0], [0], [0, 0, 1, 0], [], []>} : vector<1x66xf32>, vector<32x66xf32>, vector<1x32xf32> -> vector<1x32xf32>
    %cst_55 = arith.constant dense<0.000000e+00> : vector<32x32xf32>
    %101 = tpu.matmul %80, %80, %cst_55 {dimension_numbers = #tpu.dot_dimension_numbers<[1], [1], [0], [0], [0, 0, 1, 0], [], []>} : vector<32x66xf32>, vector<32x66xf32>, vector<32x32xf32> -> vector<32x32xf32>
    %cst_56 = arith.constant 2.000000e+00 : f32
    %102 = vector.broadcast %cst_56 : f32 to vector<32x32xf32>
    %103 = arith.mulf %102, %101 : vector<32x32xf32>
    %104 = vector.broadcast %100 : vector<1x32xf32> to vector<32x32xf32>
    %105 = arith.subf %104, %103 : vector<32x32xf32>
    %106 = arith.addf %105, %0 : vector<32x32xf32>
    %cst_57 = arith.constant 0.000000e+00 : f32
    %107 = vector.broadcast %cst_57 : f32 to vector<32x16xf32>
    %cst_58 = arith.constant dense<0x7F800000> : vector<32xf32>
    %108 = vector.multi_reduction <minimumf>, %106, %cst_58 [1] : vector<32x32xf32> to vector<32xf32>
    %109 = vector.shape_cast %108 : vector<32xf32> to vector<32x1xf32>
    %110 = vector.broadcast %109 : vector<32x1xf32> to vector<32x32xf32>
    %111 = arith.cmpf ole, %106, %110 : vector<32x32xf32>
    %cst_59 = arith.constant 3.200000e+01 : f32
    %112 = vector.broadcast %cst_59 : f32 to vector<32x32xf32>
    %113 = arith.select %111, %2, %112 : vector<32x32xi1>, vector<32x32xf32>
    %cst_60 = arith.constant dense<0x7F800000> : vector<32xf32>
    %114 = vector.multi_reduction <minimumf>, %113, %cst_60 [1] : vector<32x32xf32> to vector<32xf32>
    %115 = vector.shape_cast %114 : vector<32xf32> to vector<32x1xf32>
    %116 = vector.broadcast %115 : vector<32x1xf32> to vector<32x32xf32>
    %117 = arith.cmpf oeq, %2, %116 : vector<32x32xf32>
    %118 = arith.extui %117 : vector<32x32xi1> to vector<32x32xi32>
    %119 = arith.sitofp %118 : vector<32x32xi32> to vector<32x32xf32>
    %cst_61 = arith.constant 1.000000e+30 : f32
    %120 = vector.broadcast %cst_61 : f32 to vector<32x32xf32>
    %121 = arith.mulf %119, %120 : vector<32x32xf32>
    %122 = arith.addf %106, %121 : vector<32x32xf32>
    %cst_62 = arith.constant dense<0.000000e+00> : vector<32x16xf32>
    %123 = tpu.matmul %119, %97, %cst_62 {dimension_numbers = #tpu.dot_dimension_numbers<[1], [0], [0], [1], [0, 0, 1, 1], [], []>} : vector<32x32xf32>, vector<32x16xf32>, vector<32x16xf32> -> vector<32x16xf32>
    %124 = arith.addf %95, %123 : vector<32x16xf32>
    %cst_63 = arith.constant 0.000000e+00 : f32
    %125 = vector.broadcast %cst_63 : f32 to vector<32x16xf32>
    %126 = arith.maximumf %124, %125 : vector<32x16xf32>
    %127 = arith.addf %107, %126 : vector<32x16xf32>
    %cst_64 = arith.constant dense<0x7F800000> : vector<32xf32>
    %128 = vector.multi_reduction <minimumf>, %122, %cst_64 [1] : vector<32x32xf32> to vector<32xf32>
    %129 = vector.shape_cast %128 : vector<32xf32> to vector<32x1xf32>
    %130 = vector.broadcast %129 : vector<32x1xf32> to vector<32x32xf32>
    %131 = arith.cmpf ole, %122, %130 : vector<32x32xf32>
    %cst_65 = arith.constant 3.200000e+01 : f32
    %132 = vector.broadcast %cst_65 : f32 to vector<32x32xf32>
    %133 = arith.select %131, %2, %132 : vector<32x32xi1>, vector<32x32xf32>
    %cst_66 = arith.constant dense<0x7F800000> : vector<32xf32>
    %134 = vector.multi_reduction <minimumf>, %133, %cst_66 [1] : vector<32x32xf32> to vector<32xf32>
    %135 = vector.shape_cast %134 : vector<32xf32> to vector<32x1xf32>
    %136 = vector.broadcast %135 : vector<32x1xf32> to vector<32x32xf32>
    %137 = arith.cmpf oeq, %2, %136 : vector<32x32xf32>
    %138 = arith.extui %137 : vector<32x32xi1> to vector<32x32xi32>
    %139 = arith.sitofp %138 : vector<32x32xi32> to vector<32x32xf32>
    %cst_67 = arith.constant 1.000000e+30 : f32
    %140 = vector.broadcast %cst_67 : f32 to vector<32x32xf32>
    %141 = arith.mulf %139, %140 : vector<32x32xf32>
    %142 = arith.addf %122, %141 : vector<32x32xf32>
    %cst_68 = arith.constant dense<0.000000e+00> : vector<32x16xf32>
    %143 = tpu.matmul %139, %97, %cst_68 {dimension_numbers = #tpu.dot_dimension_numbers<[1], [0], [0], [1], [0, 0, 1, 1], [], []>} : vector<32x32xf32>, vector<32x16xf32>, vector<32x16xf32> -> vector<32x16xf32>
    %144 = arith.addf %95, %143 : vector<32x16xf32>
    %cst_69 = arith.constant 0.000000e+00 : f32
    %145 = vector.broadcast %cst_69 : f32 to vector<32x16xf32>
    %146 = arith.maximumf %144, %145 : vector<32x16xf32>
    %147 = arith.addf %127, %146 : vector<32x16xf32>
    %cst_70 = arith.constant dense<0x7F800000> : vector<32xf32>
    %148 = vector.multi_reduction <minimumf>, %142, %cst_70 [1] : vector<32x32xf32> to vector<32xf32>
    %149 = vector.shape_cast %148 : vector<32xf32> to vector<32x1xf32>
    %150 = vector.broadcast %149 : vector<32x1xf32> to vector<32x32xf32>
    %151 = arith.cmpf ole, %142, %150 : vector<32x32xf32>
    %cst_71 = arith.constant 3.200000e+01 : f32
    %152 = vector.broadcast %cst_71 : f32 to vector<32x32xf32>
    %153 = arith.select %151, %2, %152 : vector<32x32xi1>, vector<32x32xf32>
    %cst_72 = arith.constant dense<0x7F800000> : vector<32xf32>
    %154 = vector.multi_reduction <minimumf>, %153, %cst_72 [1] : vector<32x32xf32> to vector<32xf32>
    %155 = vector.shape_cast %154 : vector<32xf32> to vector<32x1xf32>
    %156 = vector.broadcast %155 : vector<32x1xf32> to vector<32x32xf32>
    %157 = arith.cmpf oeq, %2, %156 : vector<32x32xf32>
    %158 = arith.extui %157 : vector<32x32xi1> to vector<32x32xi32>
    %159 = arith.sitofp %158 : vector<32x32xi32> to vector<32x32xf32>
    %cst_73 = arith.constant dense<0.000000e+00> : vector<32x16xf32>
    %160 = tpu.matmul %159, %97, %cst_73 {dimension_numbers = #tpu.dot_dimension_numbers<[1], [0], [0], [1], [0, 0, 1, 1], [], []>} : vector<32x32xf32>, vector<32x16xf32>, vector<32x16xf32> -> vector<32x16xf32>
    %161 = arith.addf %95, %160 : vector<32x16xf32>
    %cst_74 = arith.constant 0.000000e+00 : f32
    %162 = vector.broadcast %cst_74 : f32 to vector<32x16xf32>
    %163 = arith.maximumf %161, %162 : vector<32x16xf32>
    %164 = arith.addf %147, %163 : vector<32x16xf32>
    %c0_75 = arith.constant 0 : index
    %c0_76 = arith.constant 0 : index
    %165 = vector.load %arg12[%c0_75, %c0_76] : memref<4x32xf32, #tpu.memory_space<vmem>>, vector<4x32xf32>
    %cst_77 = arith.constant dense<0.000000e+00> : vector<4x16xf32>
    %166 = tpu.matmul %165, %164, %cst_77 {dimension_numbers = #tpu.dot_dimension_numbers<[1], [0], [0], [1], [0, 0, 1, 1], [], []>} : vector<4x32xf32>, vector<32x16xf32>, vector<4x16xf32> -> vector<4x16xf32>
    %c0_78 = arith.constant 0 : index
    %c0_79 = arith.constant 0 : index
    %167 = vector.load %arg13[%c0_78, %c0_79] : memref<16x32xf32, #tpu.memory_space<vmem>>, vector<16x32xf32>
    %cst_80 = arith.constant dense<0.000000e+00> : vector<4x32xf32>
    %168 = tpu.matmul %166, %167, %cst_80 {dimension_numbers = #tpu.dot_dimension_numbers<[1], [0], [0], [1], [0, 0, 1, 1], [], []>} : vector<4x16xf32>, vector<16x32xf32>, vector<4x32xf32> -> vector<4x32xf32>
    %c0_81 = arith.constant 0 : index
    %c0_82 = arith.constant 0 : index
    %169 = vector.load %arg14[%c0_81, %c0_82] : memref<1x32xf32, #tpu.memory_space<vmem>>, vector<1x32xf32>
    %170 = vector.broadcast %169 : vector<1x32xf32> to vector<4x32xf32>
    %171 = arith.addf %168, %170 : vector<4x32xf32>
    %cst_83 = arith.constant 0.000000e+00 : f32
    %172 = vector.broadcast %cst_83 : f32 to vector<4x32xf32>
    %173 = arith.maximumf %171, %172 : vector<4x32xf32>
    %c0_84 = arith.constant 0 : index
    %c0_85 = arith.constant 0 : index
    %174 = vector.load %arg15[%c0_84, %c0_85] : memref<32x32xf32, #tpu.memory_space<vmem>>, vector<32x32xf32>
    %cst_86 = arith.constant dense<0.000000e+00> : vector<4x32xf32>
    %175 = tpu.matmul %173, %174, %cst_86 {dimension_numbers = #tpu.dot_dimension_numbers<[1], [0], [0], [1], [0, 0, 1, 1], [], []>} : vector<4x32xf32>, vector<32x32xf32>, vector<4x32xf32> -> vector<4x32xf32>
    %c0_87 = arith.constant 0 : index
    %c0_88 = arith.constant 0 : index
    %176 = vector.load %arg16[%c0_87, %c0_88] : memref<1x32xf32, #tpu.memory_space<vmem>>, vector<1x32xf32>
    %177 = vector.broadcast %176 : vector<1x32xf32> to vector<4x32xf32>
    %178 = arith.addf %175, %177 : vector<4x32xf32>
    %cst_89 = arith.constant 0.000000e+00 : f32
    %179 = vector.broadcast %cst_89 : f32 to vector<4x32xf32>
    %180 = arith.maximumf %178, %179 : vector<4x32xf32>
    %c0_90 = arith.constant 0 : index
    %c0_91 = arith.constant 0 : index
    %181 = vector.load %arg17[%c0_90, %c0_91] : memref<32x128xf32, #tpu.memory_space<vmem>>, vector<32x128xf32>
    %cst_92 = arith.constant dense<0.000000e+00> : vector<4x128xf32>
    %182 = tpu.matmul %180, %181, %cst_92 {dimension_numbers = #tpu.dot_dimension_numbers<[1], [0], [0], [1], [0, 0, 1, 1], [], []>} : vector<4x32xf32>, vector<32x128xf32>, vector<4x128xf32> -> vector<4x128xf32>
    %c0_93 = arith.constant 0 : index
    %c0_94 = arith.constant 0 : index
    %183 = vector.load %arg18[%c0_93, %c0_94] : memref<1x128xf32, #tpu.memory_space<vmem>>, vector<1x128xf32>
    %184 = vector.broadcast %183 : vector<1x128xf32> to vector<4x128xf32>
    %185 = arith.addf %182, %184 : vector<4x128xf32>
    %cst_95 = arith.constant dense<0xFF800000> : vector<4xf32>
    %186 = vector.multi_reduction <maximumf>, %185, %cst_95 [1] : vector<4x128xf32> to vector<4xf32>
    %187 = vector.shape_cast %186 : vector<4xf32> to vector<4x1xf32>
    %188 = vector.broadcast %187 : vector<4x1xf32> to vector<4x128xf32>
    %189 = arith.subf %185, %188 : vector<4x128xf32>
    %190 = math.exp %189 : vector<4x128xf32>
    %cst_96 = arith.constant dense<0.000000e+00> : vector<4xf32>
    %191 = vector.multi_reduction <add>, %190, %cst_96 [1] : vector<4x128xf32> to vector<4xf32>
    %192 = vector.shape_cast %191 : vector<4xf32> to vector<4x1xf32>
    %193 = math.log %192 : vector<4x1xf32>
    %194 = vector.broadcast %193 : vector<4x1xf32> to vector<4x128xf32>
    %195 = arith.subf %189, %194 : vector<4x128xf32>
    %c0_97 = arith.constant 0 : index
    %c0_98 = arith.constant 0 : index
    %196 = vector.load %arg19[%c0_97, %c0_98] : memref<4x128xf32, #tpu.memory_space<vmem>>, vector<4x128xf32>
    tpu.vector_store %arg19[%c0_97, %c0_98], %195 {strides = array<i32>} : memref<4x128xf32, #tpu.memory_space<vmem>>, vector<4x128xf32>,
    return
  }
}

</mosaic_0001>

<bundles_post_ra>
// kernel: net_forward.1
= control target key start
LH: loop header
LB: loop body
LE: loop exit
PB: predicated region body
PF: predicated region fallthrough
CT: control target
= control target key end

     0   :  { %s3745_s0 = inlined_call_operand.vmem [shape: f32[32,2], index: 0, kind: input, shape index: {}]   ;;  %s3746_s1 = inlined_call_operand.vmem [shape: f32[32,32], index: 1, kind: input, shape index: {}]   ;;  %s3747_s2 = inlined_call_operand.vmem [shape: f32[2,66], index: 2, kind: input, shape index: {}]   ;;  %s3748_s3 = inlined_call_operand.vmem [shape: f32[2,66], index: 3, kind: input, shape index: {}]   ;;  %s3749_s4 = inlined_call_operand.vmem [shape: f32[1,66], index: 4, kind: input, shape index: {}]   ;;  %s3750_s5 = inlined_call_operand.vmem [shape: f32[1,66], index: 5, kind: input, shape index: {}]   ;;  %s3751_s6 = inlined_call_operand.vmem [shape: f32[66,16], index: 6, kind: input, shape index: {}]   ;;  %s3752_s7 = inlined_call_operand.vmem [shape: f32[66,16], index: 7, kind: input, shape index: {}]   ;;  %s3753_s8 = inlined_call_operand.vmem [shape: f32[1,16], index: 8, kind: input, shape index: {}]   ;;  %s3754_s9 = inlined_call_operand.vmem [shape: f32[66,16], index: 9, kind: input, shape index: {}]   ;;  %s3755_s10 = inlined_call_operand.vmem [shape: f32[1,16], index: 10, kind: input, shape index: {}]   ;;  %s3756_s11 = inlined_call_operand.vmem [shape: f32[32,4], index: 11, kind: input, shape index: {}]   ;;  %s3757_s12 = inlined_call_operand.vmem [shape: f32[4,32], index: 12, kind: input, shape index: {}]   ;;  %s3758_s13 = inlined_call_operand.vmem [shape: f32[16,32], index: 13, kind: input, shape index: {}]   ;;  %s3759_s14 = inlined_call_operand.vmem [shape: f32[1,32], index: 14, kind: input, shape index: {}]   ;;  %s3760_s15 = inlined_call_operand.vmem [shape: f32[32,32], index: 15, kind: input, shape index: {}]   ;;  %s3761_s16 = inlined_call_operand.vmem [shape: f32[1,32], index: 16, kind: input, shape index: {}]   ;;  %s3762_s17 = inlined_call_operand.vmem [shape: f32[32,128], index: 17, kind: input, shape index: {}]   ;;  %s3763_s18 = inlined_call_operand.vmem [shape: f32[1,128], index: 18, kind: input, shape index: {}]   ;;  %s3764_s19 = inlined_call_operand.hbm [shape: f32[4,128], index: 19, kind: output, shape index: {}]  }
   0x1   :  { %3767 = sst [smem:[#allocation5_spill]] %s3745_s0 }
   0x2   :  { %3768 = sst [smem:[#allocation6_spill]] %s3746_s1 }
   0x3   :  { %3769 = sst [smem:[#allocation7_spill]] %s3747_s2 }
   0x4   :  { %3770 = sst [smem:[#allocation8_spill]] %s3748_s3 }
   0x5   :  { %s3771_s20 = sld [smem:[#allocation7_spill]]  ;;  %vm95_vm0 = vcmask 1041408   ;;  %vm82_vm1 = vcmask 15360  }
   0x6   :  { %s3772_s22 = sld [smem:[#allocation8_spill]] }
   0x7   :  { %s3773_s24 = sld [smem:[#allocation5_spill]] }
   0xb   :  { %v74_v0 = vld [vmem:[%s3771_s20] sm:$0x3] }
   0xc   :  { %v184_v1 = vld [vmem:[%s3772_s22] sm:$0x3]  ;;  %2715 = vmatprep.subr.msk.mxu0 %vm95_vm0, %v74_v0 }
   0xd   :  { %v70_v2 = vld [vmem:[%s3773_s24] sm:$0xff]  ;;  %2723 = vmatprep.subr.msk.mxu1 %vm95_vm0, %v184_v1  ;;  %v71_v3 = vld [vmem:[%s3773_s24 + $0x8] sm:$0xff]  ;;  %v73_v4 = vld [vmem:[%s3773_s24 + $0x18] sm:$0xff]  ;;  %2716 = vmatpush3.msk.msra.mxu0 %vm95_vm0, %v74_v0 }
   0xe   :  { %2724 = vmatpush3.msk.msra.mxu1 %vm95_vm0, %v184_v1  ;;  %v276_v5 = vmul.f32 %v73_v4, %v73_v4 }
   0xf   :  { %24 = vsyncpa [#allocation3], 0  ;;  %2725 = vmatprep.mubr.msk.f32.mxu1 %vm82_vm1, %v70_v2  ;;  %2717 = vmatprep.mubr.msk.f32.mxu0 %vm82_vm1, %v70_v2  ;;  %v72_v6 = vld [vmem:[%s3773_s24 + $0x10] sm:$0xff]  ;;  %v3023_v7 = vmov 0.0   ;;  %v274_v9 = vmul.f32 %v71_v3, %v71_v3  ;;  %vm3024_vm2 = vmmov 0   ;;  %v273_v10 = vmul.f32 %v70_v2, %v70_v2  ;;  %s3774_s20 = sld [smem:[#allocation6_spill]] }
  0x10   :  { %2726 = vmatmul.mubr.msk.f32.vlgmr.msra.gmra.mxu1 %vm82_vm1, %v71_v3  ;;  %2731 = vmatprep.subr.mxu0 %v3023_v7  ;;  %v275_v8 = vmul.f32 %v72_v6, %v72_v6  ;;  %v3025_v11 = vmov 1.0   ;;  %v67_v17 = vlaneseq  ;;  %vm463_vm3 = vcmask 261120  }
  0x11   :  { %2742 = vmatprep.subr.msk.mxu1 %vm82_vm1, %v73_v4  ;;  %2718 = vmatmul.mubr.msk.f32.vlgmr.msra.gmra.mxu0 %vm82_vm1, %v71_v3 }
  0x12   :  { %2732 = vmatpush3.xpose.msk.msra.mxu0 %vm82_vm1, %v276_v5  ;;  %2743 = vmatpush3.xpose.msk.msra.mxu1 %vm82_vm1, %v73_v4  ;;  %v3207_v20 = vshrl.u32 %v67_v17, 7  ;;  %v68_v50 = vand.u32 127, %v67_v17 }
  0x13   :  { %2728 = vmatprep.mubr.msk.f32.mxu1 %vm82_vm1, %v72_v6  ;;  %2733 = vmatprep.subr.mxu0 %v3023_v7 }
  0x14   :  { %2729 = vmatmul.mubr.msk.f32.gmra.mxu1 %vm82_vm1, %v73_v4  ;;  %2744 = vmatprep.subr.msk.mxu1 %vm82_vm1, %v72_v6  ;;  %v453_v22 = vsub.s32 0, %v3207_v20  ;;  %v3248_v51 = vcvt.s32.f32 %v68_v50 }
  0x15   :  { %2720 = vmatprep.mubr.msk.f32.mxu0 %vm82_vm1, %v72_v6  ;;  %2750 = vmatprep.mubr.msk.f32.mxu1 %vm82_vm1, %v70_v2  ;;  %v3223_v31 = vld [vmem:[%s3774_s20] sm:$0xff]  ;;  %v3228_v35 = vld [vmem:[%s3774_s20 + $0x8] sm:$0xff]  ;;  %v3234_v39 = vld [vmem:[%s3774_s20 + $0x10] sm:$0xff] }
  0x16   :  { %2734 = vmatpush3.xpose.msk.msra.mxu0 %vm82_vm1, %v275_v8  ;;  %2745 = vmatpush3.xpose.msk.msra.mxu1 %vm82_vm1, %v72_v6  ;;  %v3241_v44 = vld [vmem:[%s3774_s20 + $0x18] sm:$0xff] }
  0x17   :  { %2735 = vmatprep.subr.mxu0 %v3023_v7  ;;  %2746 = vmatprep.subr.msk.mxu1 %vm82_vm1, %v71_v3 }
  0x18   :  { %2721 = vmatmul.mubr.msk.f32.gmra.mxu0 %vm82_vm1, %v73_v4 }
  0x19   :  { %2739 = vmatprep.mubr.msk.f32.mxu0 %vm3024_vm2, %v3023_v7 }
  0x1a   :  { %2736 = vmatpush3.xpose.msk.msra.mxu0 %vm82_vm1, %v274_v9  ;;  %2747 = vmatpush3.xpose.msk.msra.mxu1 %vm82_vm1, %v71_v3 }
  0x1b   :  { %2737 = vmatprep.subr.mxu0 %v3023_v7  ;;  %2748 = vmatprep.subr.msk.mxu1 %vm82_vm1, %v70_v2 }
  0x1e   :  { %2738 = vmatpush3.xpose.msk.msra.mxu0 %vm82_vm1, %v273_v10  ;;  %2749 = vmatpush3.xpose.msk.msra.mxu1 %vm82_vm1, %v70_v2 }
  0x21   :  { %2740 = vmatmul.mubr.msk.f32.vlgmr.msra.gmra.mxu0 %vm82_vm1, %v3025_v11  ;;  %2751 = vmatmul.mubr.msk.f32.vlgmr.msra.gmra.mxu1 %vm82_vm1, %v71_v3 }
  0x22   :  { %2753 = vmatprep.mubr.msk.f32.mxu1 %vm82_vm1, %v72_v6 }
  0x25   :  { %2754 = vmatmul.mubr.msk.f32.gmra.mxu1 %vm82_vm1, %v73_v4 }
  0xd0   :  { %v3181_v12 = vpop.f32.mrf.mxu1 }
  0xd1   :  { %v3185_v14 = vpop.f32.mrf.mxu0 }
  0xd2   :  { %v3183_v13 = vpop.f32.mrf.mxu1 }
  0xd3   :  { %v3195_v18 = vpop.f32.mrf.mxu0 }
  0xd4   :  { %v3187_v15 = vpop.f32.mrf.mxu1 }
  0xd5   :  { %2756 = vmatprep.subr.mxu0 %v3187_v15  ;;  %2770 = vmatprep.subr.mxu1 %v3187_v15 }
  0xd6   :  { %v3191_v16 = vpop.f32.mrf.mxu1  ;;  %2757 = vmatpush3.msra.mxu0 %v3187_v15  ;;  %2771 = vmatpush3.msra.mxu1 %v3187_v15 }
  0xd7   :  { %2758 = vmatprep.subr.mxu0 %v3191_v16  ;;  %2772 = vmatprep.subr.mxu1 %v3191_v16 }
  0xd8   :  { %2759 = vmatpush3.msra.mxu0 %v3191_v16  ;;  %2773 = vmatpush3.msra.mxu1 %v3191_v16  ;;  %v3203_v19 = vpop.f32.mrf.mxu0 }
  0xd9   :  { %2760 = vmatprep.subr.mxu0 %v3181_v12  ;;  %2774 = vmatprep.subr.mxu1 %v3181_v12 }
  0xda   :  { %2761 = vmatpush3.msra.mxu0 %v3181_v12  ;;  %2775 = vmatpush3.msra.mxu1 %v3181_v12  ;;  %v3214_v21 = vpop.f32.mrf.mxu0 }
  0xdb   :  { %2762 = vmatprep.subr.mxu0 %v3183_v13  ;;  %2776 = vmatprep.subr.mxu1 %v3183_v13 }
  0xdc   :  { %2763 = vmatpush3.msra.mxu0 %v3183_v13  ;;  %2777 = vmatpush3.msra.mxu1 %v3183_v13 }
  0xdd   :  { %2784 = vmatprep.subr.mxu0 %v3187_v15  ;;  %2798 = vmatprep.subr.mxu1 %v3023_v7 }
  0xe1   :  { %v358_v23 = vpop.f32.mrf.mxu0  ;;  %v2752_v24 = vpop.f32.mrf.mxu1 }
  0xe2   :  { %v454_v25 = vrot.slane %v358_v23, %v453_v22  ;;  %v448_v26 = vmul.f32 2.0, %v2752_v24 }
  0xe3   :  { %v2741_v27 = vpop.f32.mrf.mxu0  ;;  %v428_v28 = vpop.f32.mrf.mxu1 }
  0xe4   :  { %v447_v29 = vmul.f32 2.0, %v428_v28  ;;  %v456_v32 = vsub.f32 %v454_v25, %v448_v26 }
  0xe5   :  { %v2755_v30 = vpop.f32.mrf.mxu1 }
  0xe6   :  { %v455_v33 = vsub.f32 %v454_v25, %v447_v29  ;;  %v450_v34 = vmul.f32 2.0, %v2755_v30  ;;  %v460_v40 = vadd.f32 %v456_v32, %v3228_v35 }
  0xe7   :  { %v438_v36 = vpop.f32.mrf.mxu1 }
  0xe8   :  { %v449_v37 = vmul.f32 2.0, %v438_v36  ;;  %v459_v38 = vadd.f32 %v455_v33, %v3223_v31  ;;  %v458_v41 = vsub.f32 %v454_v25, %v450_v34  ;;  %v467_v48 = vsel %vm463_vm3, %v460_v40, inf }
  0xea   :  { %v457_v42 = vsub.f32 %v454_v25, %v449_v37  ;;  %v464_v43 = vsel %vm463_vm3, %v459_v38, inf  ;;  %v462_v46 = vadd.f32 %v458_v41, %v3241_v44 }
  0xeb   :  { %465 = vmin.xlane.f32.xlu0 %v464_v43 }
  0xec   :  { %v461_v45 = vadd.f32 %v457_v42, %v3234_v39  ;;  %v473_v49 = vsel %vm463_vm3, %v462_v46, inf }
  0xee   :  { %v470_v47 = vsel %vm463_vm3, %v461_v45, inf }
  0xef   :  { %471 = vmin.xlane.f32.xlu1 %v470_v47  ;;  %468 = vmin.xlane.f32.xlu0 %v467_v48 }
  0xf3   :  { %474 = vmin.xlane.f32.xlu1 %v473_v49 }
 0x174   :  { %v466_v52 = vpop.xlane.xlu0 %465 }
 0x175   :  { %vm476_vm4 = vcmp.le.f32.partialorder %v459_v38, %v466_v52 }
 0x176   :  { %v480_v53 = vsel %vm476_vm4, %v3248_v51, 32.0 }
 0x177   :  { %v484_v54 = vsel %vm463_vm3, %v480_v53, inf }
 0x178   :  { %v472_v55 = vpop.xlane.xlu1 %471  ;;  %485 = vmin.xlane.f32.xlu0 %v484_v54  ;;  %v469_v56 = vpop.xlane.xlu0 %468 }
 0x179   :  { %vm478_vm5 = vcmp.le.f32.partialorder %v461_v45, %v472_v55  ;;  %vm477_vm6 = vcmp.le.f32.partialorder %v460_v40, %v469_v56 }
 0x17a   :  { %v482_v57 = vsel %vm478_vm5, %v3248_v51, 32.0  ;;  %v481_v58 = vsel %vm477_vm6, %v3248_v51, 32.0 }
 0x17b   :  { %v490_v59 = vsel %vm463_vm3, %v482_v57, inf  ;;  %v487_v60 = vsel %vm463_vm3, %v481_v58, inf }
 0x17c   :  { %v475_v61 = vpop.xlane.xlu1 %474  ;;  %491 = vmin.xlane.f32.xlu0 %v490_v59  ;;  %488 = vmin.xlane.f32.xlu1 %v487_v60 }
 0x17d   :  { %vm479_vm7 = vcmp.le.f32.partialorder %v462_v46, %v475_v61 }
 0x17e   :  { %v483_v62 = vsel %vm479_vm7, %v3248_v51, 32.0 }
 0x17f   :  { %v493_v63 = vsel %vm463_vm3, %v483_v62, inf }
 0x180   :  { %494 = vmin.xlane.f32.xlu1 %v493_v63 }
 0x201   :  { %v486_v0 = vpop.xlane.xlu0 %485 }
 0x202   :  { %vm496_vm8 = vcmp.eq.f32.partialorder %v3248_v51, %v486_v0 }
 0x203   :  { %v2478_v1 = vsel %vm496_vm8, 1.0, %v3023_v7 }
 0x204   :  { %v508_v2 = vmul.f32 1e+30, %v2478_v1  ;;  %2764 = vmatprep.mubr.msk.f32.mxu0 %vm463_vm3, %v2478_v1 }
 0x205   :  { %v489_v3 = vpop.xlane.xlu1 %488  ;;  %v492_v4 = vpop.xlane.xlu0 %491 }
 0x206   :  { %v512_v5 = vadd.f32 %v508_v2, %v459_v38  ;;  %vm497_vm9 = vcmp.eq.f32.partialorder %v3248_v51, %v489_v3  ;;  %vm498_vm10 = vcmp.eq.f32.partialorder %v3248_v51, %v492_v4 }
 0x207   :  { %v2479_v6 = vsel %vm497_vm9, 1.0, %v3023_v7  ;;  %v2480_v8 = vsel %vm498_vm10, 1.0, %v3023_v7 }
 0x208   :  { %v509_v9 = vmul.f32 1e+30, %v2479_v6  ;;  %v510_v10 = vmul.f32 1e+30, %v2480_v8  ;;  %2765 = vmatmul.mubr.msk.f32.vlgmr.msra.gmra.mxu0 %vm463_vm3, %v2479_v6  ;;  %v625_v17 = vsel %vm463_vm3, %v512_v5, inf }
 0x209   :  { %2785 = vmatpush3.msra.mxu0 %v3187_v15  ;;  %v495_v23 = vpop.xlane.xlu1 %494  ;;  %626 = vmin.xlane.f32.xlu0 %v625_v17 }
 0x20a   :  { %v513_v24 = vadd.f32 %v509_v9, %v460_v40  ;;  %v514_v25 = vadd.f32 %v510_v10, %v461_v45  ;;  %vm499_vm11 = vcmp.eq.f32.partialorder %v3248_v51, %v495_v23  ;;  %2786 = vmatprep.subr.mxu0 %v3191_v16  ;;  %2767 = vmatprep.mubr.msk.f32.mxu0 %vm463_vm3, %v2480_v8 }
 0x20b   :  { %v2481_v26 = vsel %vm499_vm11, 1.0, %v3023_v7  ;;  %2787 = vmatpush3.msra.mxu0 %v3191_v16 }
 0x20c   :  { %v511_v27 = vmul.f32 1e+30, %v2481_v26  ;;  %2788 = vmatprep.subr.mxu0 %v3181_v12  ;;  %2768 = vmatmul.mubr.msk.f32.gmra.mxu0 %vm463_vm3, %v2481_v26  ;;  %v628_v15 = vsel %vm463_vm3, %v513_v24, inf  ;;  %v631_v28 = vsel %vm463_vm3, %v514_v25, inf }
 0x20d   :  { %2789 = vmatpush3.msra.mxu0 %v3181_v12  ;;  %629 = vmin.xlane.f32.xlu1 %v628_v15 }
 0x20e   :  { %v515_v29 = vadd.f32 %v511_v27, %v462_v46  ;;  %2790 = vmatprep.subr.mxu0 %v3183_v13  ;;  %632 = vmin.xlane.f32.xlu0 %v631_v28 }
 0x20f   :  { %2791 = vmatpush3.msra.mxu0 %v3183_v13 }
 0x210   :  { %v634_v16 = vsel %vm463_vm3, %v515_v29, inf  ;;  %2809 = vmatprep.subr.mxu0 %v3023_v7 }
 0x211   :  { %635 = vmin.xlane.f32.xlu1 %v634_v16 }
 0x292   :  { %v627_v30 = vpop.xlane.xlu0 %626 }
 0x293   :  { %vm637_vm12 = vcmp.le.f32.partialorder %v512_v5, %v627_v30 }
 0x294   :  { %v641_v32 = vsel %vm637_vm12, %v3248_v51, 32.0 }
 0x295   :  { %v645_v33 = vsel %vm463_vm3, %v641_v32, inf  ;;  %v1032_v32 = vld [vmem:[%s3754_s9 + $0x40] sm:$0x3] }
 0x296   :  { %v630_v34 = vpop.xlane.xlu1 %629  ;;  %646 = vmin.xlane.f32.xlu0 %v645_v33  ;;  %v1031_v33 = vld [vmem:[%s3754_s9 + $0x38] sm:$0xff] }
 0x297   :  { %vm638_vm13 = vcmp.le.f32.partialorder %v513_v24, %v630_v34  ;;  %v633_v12 = vpop.xlane.xlu0 %632  ;;  %v1030_v34 = vld [vmem:[%s3754_s9 + $0x30] sm:$0xff] }
 0x298   :  { %vm639_vm14 = vcmp.le.f32.partialorder %v514_v25, %v633_v12  ;;  %v642_v36 = vsel %vm638_vm13, %v3248_v51, 32.0  ;;  %v1029_v12 = vld [vmem:[%s3754_s9 + $0x28] sm:$0xff] }
 0x299   :  { %v648_v13 = vsel %vm463_vm3, %v642_v36, inf  ;;  %v643_v37 = vsel %vm639_vm14, %v3248_v51, 32.0  ;;  %v1028_v36 = vld [vmem:[%s3754_s9 + $0x20] sm:$0xff] }
 0x29a   :  { %649 = vmin.xlane.f32.xlu1 %v648_v13  ;;  %v636_v38 = vpop.xlane.xlu1 %635  ;;  %v651_v40 = vsel %vm463_vm3, %v643_v37, inf  ;;  %v1027_v13 = vld [vmem:[%s3754_s9 + $0x18] sm:$0xff]  ;;  %v1026_v37 = vld [vmem:[%s3754_s9 + $0x10] sm:$0xff] }
 0x29b   :  { %vm640_vm15 = vcmp.le.f32.partialorder %v515_v29, %v636_v38  ;;  %652 = vmin.xlane.f32.xlu0 %v651_v40  ;;  %v1025_v38 = vld [vmem:[%s3754_s9 + $0x8] sm:$0xff] }
 0x29c   :  { %v644_v41 = vsel %vm640_vm15, %v3248_v51, 32.0  ;;  %vm1040_vm15 = vcmask 539648  }
 0x29d   :  { %v654_v42 = vsel %vm463_vm3, %v644_v41, inf }
 0x29e   :  { %655 = vmin.xlane.f32.xlu1 %v654_v42 }
 0x2c8   :  { %v2766_v41 = vpop.f32.mrf.mxu0 }
 0x31f   :  { %v647_v43 = vpop.xlane.xlu0 %646 }
 0x320   :  { %vm657_vm1 = vcmp.eq.f32.partialorder %v3248_v51, %v647_v43  ;;  %v594_v43 = vpop.f32.mrf.mxu0 }
 0x321   :  { %v2486_v45 = vsel %vm657_vm1, 1.0, %v3023_v7  ;;  %vm1250_vm1 = vcmask 1043456  }
 0x322   :  { %v669_v46 = vmul.f32 1e+30, %v2486_v45  ;;  %2778 = vmatprep.mubr.msk.f32.mxu1 %vm463_vm3, %v2486_v45 }
 0x323   :  { %v650_v47 = vpop.xlane.xlu1 %649 }
 0x324   :  { %vm658_vm4 = vcmp.eq.f32.partialorder %v3248_v51, %v650_v47  ;;  %v653_v48 = vpop.xlane.xlu0 %652  ;;  %v673_v49 = vadd.f32 %v669_v46, %v512_v5  ;;  %v2769_v46 = vpop.f32.mrf.mxu0  ;;  %v2454_v47 = vld [vmem:[%s3749_s4] ss:$0 sm:$0xff] }
 0x325   :  { %v2487_v50 = vsel %vm658_vm4, 1.0, %v3023_v7  ;;  %vm659_vm5 = vcmp.eq.f32.partialorder %v3248_v51, %v653_v48  ;;  %v181_v48 = vadd.f32 %v3203_v19, %v2454_v47 }
 0x326   :  { %v670_v52 = vmul.f32 1e+30, %v2487_v50  ;;  %v2488_v53 = vsel %vm659_vm5, 1.0, %v3023_v7  ;;  %2779 = vmatmul.mubr.msk.f32.vlgmr.msra.gmra.mxu1 %vm463_vm3, %v2487_v50  ;;  %v786_v54 = vsel %vm463_vm3, %v673_v49, inf  ;;  %v176_v50 = vadd.f32 %v2454_v47, %v3214_v21 }
 0x327   :  { %v671_v55 = vmul.f32 1e+30, %v2488_v53  ;;  %v656_v56 = vpop.xlane.xlu1 %655  ;;  %787 = vmin.xlane.f32.xlu0 %v786_v54  ;;  %2781 = vmatprep.mubr.msk.f32.mxu1 %vm463_vm3, %v2488_v53  ;;  %v171_v54 = vadd.f32 %v3185_v14, %v2454_v47 }
 0x328   :  { %vm660_vm6 = vcmp.eq.f32.partialorder %v3248_v51, %v656_v56  ;;  %v674_v57 = vadd.f32 %v670_v52, %v513_v24  ;;  %v604_v52 = vpop.f32.mrf.mxu0 }
 0x329   :  { %v2489_v58 = vsel %vm660_vm6, 1.0, %v3023_v7  ;;  %v675_v59 = vadd.f32 %v671_v55, %v514_v25 }
 0x32a   :  { %v672_v60 = vmul.f32 1e+30, %v2489_v58  ;;  %2782 = vmatmul.mubr.msk.f32.gmra.mxu1 %vm463_vm3, %v2489_v58  ;;  %v789_v61 = vsel %vm463_vm3, %v674_v57, inf  ;;  %v616_v58 = vadd.f32 %v2769_v46, %v181_v48  ;;  %v1117_v46 = vld [vmem:[%s3751_s6] sm:$0xff] }
 0x32b   :  { %790 = vmin.xlane.f32.xlu1 %v789_v61  ;;  %v792_v62 = vsel %vm463_vm3, %v675_v59, inf  ;;  %2806 = vmatprep.mubr.msk.f32.mxu1 %vm3024_vm2, %v3023_v7 }
 0x32c   :  { %793 = vmin.xlane.f32.xlu0 %v792_v62  ;;  %v676_v63 = vadd.f32 %v672_v60, %v515_v29 }
 0x32e   :  { %v795_v0 = vsel %vm463_vm3, %v676_v63, inf }
 0x32f   :  { %796 = vmin.xlane.f32.xlu1 %v795_v0  ;;  %v614_v0 = vadd.f32 %v2766_v41, %v171_v54  ;;  %v1121_v41 = vld [vmem:[%s3751_s6 + $0x20] sm:$0xff] }
 0x3b0   :  { %v788_v1 = vpop.xlane.xlu0 %787 }
 0x3b1   :  { %vm798_vm7 = vcmp.le.f32.partialorder %v673_v49, %v788_v1 }
 0x3b2   :  { %v802_v2 = vsel %vm798_vm7, %v3248_v51, 32.0 }
 0x3b3   :  { %v806_v3 = vsel %vm463_vm3, %v802_v2, inf }
 0x3b4   :  { %v791_v4 = vpop.xlane.xlu1 %790  ;;  %807 = vmin.xlane.f32.xlu0 %v806_v3  ;;  %v620_v3 = vmax.f32 %v616_v58, 0.0  ;;  %v1344_v58 = vld [vmem:[%s3752_s7 + $0x8] sm:$0xff] }
 0x3b5   :  { %vm799_vm8 = vcmp.le.f32.partialorder %v674_v57, %v791_v4  ;;  %v794_v5 = vpop.xlane.xlu0 %793  ;;  %v166_v57 = vadd.f32 %v2454_v47, %v3195_v18  ;;  %v1351_v47 = vld [vmem:[%s3752_s7 + $0x40] sm:$0x3] }
 0x3b6   :  { %vm800_vm9 = vcmp.le.f32.partialorder %v675_v59, %v794_v5  ;;  %v803_v6 = vsel %vm799_vm8, %v3248_v51, 32.0  ;;  %v615_v59 = vadd.f32 %v604_v52, %v176_v50  ;;  %v1349_v52 = vld [vmem:[%s3752_s7 + $0x30] sm:$0xff] }
 0x3b7   :  { %v809_v8 = vsel %vm463_vm3, %v803_v6, inf  ;;  %v804_v9 = vsel %vm800_vm9, %v3248_v51, 32.0  ;;  %v613_v1 = vadd.f32 %v594_v43, %v166_v57  ;;  %v1119_v43 = vld [vmem:[%s3751_s6 + $0x10] sm:$0xff] }
 0x3b8   :  { %810 = vmin.xlane.f32.xlu1 %v809_v8  ;;  %v797_v10 = vpop.xlane.xlu1 %796  ;;  %v812_v17 = vsel %vm463_vm3, %v804_v9, inf  ;;  %v619_v6 = vmax.f32 %v615_v59, 0.0  ;;  %v1343_v59 = vld [vmem:[%s3752_s7] sm:$0xff] }
 0x3b9   :  { %vm801_vm10 = vcmp.le.f32.partialorder %v676_v63, %v797_v10  ;;  %813 = vmin.xlane.f32.xlu0 %v812_v17 }
 0x3ba   :  { %v805_v23 = vsel %vm801_vm10, %v3248_v51, 32.0 }
 0x3bb   :  { %v815_v24 = vsel %vm463_vm3, %v805_v23, inf  ;;  %v618_v23 = vmax.f32 %v614_v0, 0.0 }
 0x3bc   :  { %816 = vmin.xlane.f32.xlu1 %v815_v24  ;;  %v617_v24 = vmax.f32 %v613_v1, 0.0 }
 0x3e6   :  { %v2780_v40 = vpop.f32.mrf.mxu1 }
 0x3e7   :  { %v775_v60 = vadd.f32 %v2780_v40, %v171_v54  ;;  %v1122_v40 = vld [vmem:[%s3751_s6 + $0x28] sm:$0xff] }
 0x3e8   :  { %v755_v42 = vpop.f32.mrf.mxu1 }
 0x3e9   :  { %v774_v62 = vadd.f32 %v755_v42, %v166_v57  ;;  %v779_v14 = vmax.f32 %v775_v60, 0.0  ;;  %v1120_v42 = vld [vmem:[%s3751_s6 + $0x18] sm:$0xff]  ;;  %v1024_v60 = vld [vmem:[%s3754_s9] sm:$0xff] }
 0x3ea   :  { %v2783_v45 = vpop.f32.mrf.mxu1 }
 0x3eb   :  { %v777_v53 = vadd.f32 %v2783_v45, %v181_v48  ;;  %v778_v9 = vmax.f32 %v774_v62, 0.0  ;;  %v1118_v45 = vld [vmem:[%s3751_s6 + $0x8] sm:$0xff] }
 0x3ec   :  { %v765_v49 = vpop.f32.mrf.mxu1 }
 0x3ed   :  { %v776_v55 = vadd.f32 %v765_v49, %v176_v50  ;;  %v781_v63 = vmax.f32 %v777_v53, 0.0 }
 0x3ef   :  { %v780_v19 = vmax.f32 %v776_v55, 0.0  ;;  %v785_v10 = vadd.f32 %v781_v63, %v620_v3  ;;  %v1347_v55 = vld [vmem:[%s3752_s7 + $0x20] sm:$0xff] }
 0x43d   :  { %v808_v25 = vpop.xlane.xlu0 %807 }
 0x43e   :  { %vm818_vm11 = vcmp.eq.f32.partialorder %v3248_v51, %v808_v25  ;;  %v784_v25 = vadd.f32 %v780_v19, %v619_v6  ;;  %v2504_v6 = vld [vmem:[%s3755_s10] ss:$0 sm:$0xff] }
 0x43f   :  { %v2494_v26 = vsel %vm818_vm11, 1.0, %v3023_v7 }
 0x440   :  { %2792 = vmatprep.mubr.msk.f32.mxu0 %vm463_vm3, %v2494_v26 }
 0x441   :  { %v811_v27 = vpop.xlane.xlu1 %810 }
 0x442   :  { %vm819_vm12 = vcmp.eq.f32.partialorder %v3248_v51, %v811_v27  ;;  %v814_v15 = vpop.xlane.xlu0 %813 }
 0x443   :  { %v2495_v28 = vsel %vm819_vm12, 1.0, %v3023_v7  ;;  %vm820_vm13 = vcmp.eq.f32.partialorder %v3248_v51, %v814_v15 }
 0x444   :  { %v2496_v29 = vsel %vm820_vm13, 1.0, %v3023_v7  ;;  %2793 = vmatmul.mubr.msk.f32.vlgmr.msra.gmra.mxu0 %vm463_vm3, %v2495_v28 }
 0x445   :  { %v817_v16 = vpop.xlane.xlu1 %816  ;;  %2795 = vmatprep.mubr.msk.f32.mxu0 %vm463_vm3, %v2496_v29  ;;  %2810 = vmatpush3.msk.msra.mxu0 %vm95_vm0, %v1032_v32  ;;  %v783_v29 = vadd.f32 %v779_v14, %v618_v23  ;;  %v1236_v23 = vld [vmem:[%s3756_s11 + $0x18] sm:$0xff] }
 0x446   :  { %vm821_vm14 = vcmp.eq.f32.partialorder %v3248_v51, %v817_v16  ;;  %2811 = vmatprep.subr.mxu0 %v3023_v7  ;;  %v782_v16 = vadd.f32 %v778_v9, %v617_v24 }
 0x447   :  { %v2497_v30 = vsel %vm821_vm14, 1.0, %v3023_v7  ;;  %2812 = vmatpush3.msra.mxu0 %v1031_v33 }
 0x448   :  { %2796 = vmatmul.mubr.msk.f32.gmra.mxu0 %vm463_vm3, %v2497_v30  ;;  %2813 = vmatprep.subr.mxu0 %v3023_v7 }
 0x449   :  { %2827 = vmatprep.mubr.msk.f32.mxu0 %vm3024_vm2, %v3023_v7  ;;  %2814 = vmatpush3.msra.mxu0 %v1030_v34  ;;  %v3375_v34 = vld [vmem:[%s3757_s12] sm:$0xf] }
 0x44a   :  { %2815 = vmatprep.subr.mxu0 %v3023_v7 }
 0x44b   :  { %2816 = vmatpush3.msra.mxu0 %v1029_v12  ;;  %v1125_v12 = vld [vmem:[%s3751_s6 + $0x40] sm:$0x3] }
 0x44c   :  { %2817 = vmatprep.subr.mxu0 %v3023_v7 }
 0x44d   :  { %2818 = vmatpush3.msra.mxu0 %v1028_v36  ;;  %v2502_v36 = vld [vmem:[%s3750_s5] ss:$0 sm:$0xff] }
 0x44e   :  { %2819 = vmatprep.subr.mxu0 %v3023_v7 }
 0x44f   :  { %2820 = vmatpush3.msra.mxu0 %v1027_v13 }
 0x450   :  { %2821 = vmatprep.subr.mxu0 %v3023_v7 }
 0x451   :  { %2822 = vmatpush3.msra.mxu0 %v1026_v37  ;;  %v1124_v37 = vld [vmem:[%s3751_s6 + $0x38] sm:$0xff] }
 0x452   :  { %2823 = vmatprep.subr.mxu0 %v3023_v7 }
 0x453   :  { %2824 = vmatpush3.msra.mxu0 %v1025_v38  ;;  %v1123_v38 = vld [vmem:[%s3751_s6 + $0x30] sm:$0xff] }
 0x454   :  { %2825 = vmatprep.subr.mxu0 %v3023_v7 }
 0x455   :  { %2826 = vmatpush3.msra.mxu0 %v1024_v60 }
 0x504   :  { %v2794_v56 = vpop.f32.mrf.mxu0 }
 0x505   :  { %v928_v21 = vadd.f32 %v2794_v56, %v171_v54  ;;  %v1348_v54 = vld [vmem:[%s3752_s7 + $0x28] sm:$0xff]  ;;  %v1346_v56 = vld [vmem:[%s3752_s7 + $0x18] sm:$0xff] }
 0x506   :  { %v908_v61 = vpop.f32.mrf.mxu0 }
 0x507   :  { %v927_v4 = vadd.f32 %v908_v61, %v166_v57  ;;  %v932_v26 = vmax.f32 %v928_v21, 0.0  ;;  %v1345_v57 = vld [vmem:[%s3752_s7 + $0x10] sm:$0xff] }
 0x508   :  { %v2797_v2 = vpop.f32.mrf.mxu0 }
 0x509   :  { %v930_v5 = vadd.f32 %v2797_v2, %v181_v48  ;;  %v931_v27 = vmax.f32 %v927_v4, 0.0  ;;  %v936_v32 = vadd.f32 %v932_v26, %v783_v29 }
 0x50a   :  { %v918_v8 = vpop.f32.mrf.mxu0 }
 0x50b   :  { %v934_v18 = vmax.f32 %v930_v5, 0.0  ;;  %v929_v17 = vadd.f32 %v918_v8, %v176_v50  ;;  %v935_v33 = vadd.f32 %v931_v27, %v782_v16  ;;  %v3419_v48 = vmul.f32 %v2502_v36, %v936_v32  ;;  %v1350_v50 = vld [vmem:[%s3752_s7 + $0x38] sm:$0xff]  ;;  %v1233_v5 = vld [vmem:[%s3756_s11] sm:$0xff] }
 0x50d   :  { %v938_v15 = vadd.f32 %v934_v18, %v785_v10  ;;  %v933_v28 = vmax.f32 %v929_v17, 0.0  ;;  %v3384_v13 = vmul.f32 %v2502_v36, %v935_v33  ;;  %v1234_v10 = vld [vmem:[%s3756_s11 + $0x8] sm:$0xff]  ;;  %v1235_v18 = vld [vmem:[%s3756_s11 + $0x10] sm:$0xff] }
 0x50f   :  { %v937_v30 = vadd.f32 %v933_v28, %v784_v25  ;;  %2799 = vmatpush3.msra.mxu1 %v938_v15  ;;  %v3435_v53 = vmul.f32 %v2502_v36, %v938_v15  ;;  %v1441_v25 = vmul.f32 %v3419_v48, %v3419_v48  ;;  %v1440_v26 = vmul.f32 %v3384_v13, %v3384_v13 }
 0x510   :  { %2800 = vmatprep.subr.mxu1 %v3023_v7 }
 0x511   :  { %2801 = vmatpush3.msra.mxu1 %v937_v30  ;;  %v3421_v49 = vmul.f32 %v2502_v36, %v937_v30  ;;  %v1443_v17 = vmul.f32 %v3435_v53, %v3435_v53 }
 0x512   :  { %2802 = vmatprep.subr.mxu1 %v3023_v7 }
 0x513   :  { %2803 = vmatpush3.msra.mxu1 %v936_v32  ;;  %v1442_v24 = vmul.f32 %v3421_v49, %v3421_v49 }
 0x514   :  { %2804 = vmatprep.subr.mxu1 %v3023_v7 }
 0x515   :  { %2805 = vmatpush3.msra.mxu1 %v935_v33 }
 0x516   :  { %2807 = vmatmul.mubr.msk.f32.vlgmr.msra.gmra.mxu1 %vm463_vm3, %v3375_v34  ;;  %2830 = vmatprep.subr.msk.mxu1 %vm95_vm0, %v1125_v12 }
 0x517   :  { %2831 = vmatpush3.msk.msra.mxu1 %vm95_vm0, %v1125_v12  ;;  %2848 = vmatprep.mubr.msk.f32.mxu1 %vm1040_vm15, %v3384_v13 }
 0x518   :  { %2832 = vmatprep.subr.mxu1 %v1124_v37 }
 0x519   :  { %2833 = vmatpush3.msra.mxu1 %v1124_v37 }
 0x51a   :  { %2834 = vmatprep.subr.mxu1 %v1123_v38 }
 0x51b   :  { %2835 = vmatpush3.msra.mxu1 %v1123_v38 }
 0x51c   :  { %2836 = vmatprep.subr.mxu1 %v1122_v40 }
 0x51d   :  { %2837 = vmatpush3.msra.mxu1 %v1122_v40 }
 0x51e   :  { %2838 = vmatprep.subr.mxu1 %v1121_v41 }
 0x51f   :  { %2839 = vmatpush3.msra.mxu1 %v1121_v41 }
 0x520   :  { %2840 = vmatprep.subr.mxu1 %v1120_v42 }
 0x521   :  { %2841 = vmatpush3.msra.mxu1 %v1120_v42 }
 0x522   :  { %2842 = vmatprep.subr.mxu1 %v1119_v43 }
 0x523   :  { %2843 = vmatpush3.msra.mxu1 %v1119_v43 }
 0x524   :  { %2844 = vmatprep.subr.mxu1 %v1118_v45 }
 0x525   :  { %2845 = vmatpush3.msra.mxu1 %v1118_v45 }
 0x526   :  { %2846 = vmatprep.subr.mxu1 %v1117_v46 }
 0x527   :  { %2847 = vmatpush3.msra.mxu1 %v1117_v46 }
 0x528   :  { %2849 = vmatmul.mubr.msk.f32.vlgmr.msra.gmra.mxu1 %vm1040_vm15, %v3419_v48  ;;  %2862 = vmatprep.subr.msk.mxu1 %vm95_vm0, %v1351_v47 }
 0x529   :  { %2851 = vmatprep.mubr.msk.f32.mxu1 %vm1040_vm15, %v3421_v49  ;;  %2863 = vmatpush3.msk.msra.mxu1 %vm95_vm0, %v1351_v47  ;;  %vm1237_vm0 = vcmask 31744  }
 0x52a   :  { %2864 = vmatprep.subr.mxu1 %v1350_v50 }
 0x52b   :  { %2865 = vmatpush3.msra.mxu1 %v1350_v50 }
 0x52c   :  { %2852 = vmatmul.mubr.msk.f32.gmra.mxu1 %vm1040_vm15, %v3435_v53  ;;  %2866 = vmatprep.subr.mxu1 %v1349_v52 }
 0x52d   :  { %2867 = vmatpush3.msra.mxu1 %v1349_v52  ;;  %2880 = vmatprep.mubr.msk.f32.mxu1 %vm1040_vm15, %v3384_v13 }
 0x52e   :  { %2868 = vmatprep.subr.mxu1 %v1348_v54 }
 0x52f   :  { %2869 = vmatpush3.msra.mxu1 %v1348_v54 }
 0x530   :  { %2870 = vmatprep.subr.mxu1 %v1347_v55 }
 0x531   :  { %2871 = vmatpush3.msra.mxu1 %v1347_v55 }
 0x532   :  { %2872 = vmatprep.subr.mxu1 %v1346_v56 }
 0x533   :  { %2873 = vmatpush3.msra.mxu1 %v1346_v56 }
 0x534   :  { %2874 = vmatprep.subr.mxu1 %v1345_v57 }
 0x535   :  { %2875 = vmatpush3.msra.mxu1 %v1345_v57 }
 0x536   :  { %2876 = vmatprep.subr.mxu1 %v1344_v58 }
 0x537   :  { %2877 = vmatpush3.msra.mxu1 %v1344_v58 }
 0x538   :  { %2878 = vmatprep.subr.mxu1 %v1343_v59 }
 0x539   :  { %2879 = vmatpush3.msra.mxu1 %v1343_v59 }
 0x53a   :  { %2881 = vmatmul.mubr.msk.f32.vlgmr.msra.gmra.mxu1 %vm1040_vm15, %v3419_v48  ;;  %2897 = vmatprep.subr.msk.mxu1 %vm1040_vm15, %v3435_v53 }
 0x53b   :  { %2883 = vmatprep.mubr.msk.f32.mxu1 %vm1040_vm15, %v3421_v49  ;;  %2898 = vmatpush3.xpose.msk.msra.mxu1 %vm1040_vm15, %v3435_v53 }
 0x53c   :  { %2899 = vmatprep.subr.msk.mxu1 %vm1040_vm15, %v3421_v49 }
 0x53e   :  { %2884 = vmatmul.mubr.msk.f32.gmra.mxu1 %vm1040_vm15, %v3435_v53 }
 0x53f   :  { %2900 = vmatpush3.xpose.msk.msra.mxu1 %vm1040_vm15, %v3421_v49  ;;  %2905 = vmatprep.mubr.msk.f32.mxu1 %vm1040_vm15, %v3384_v13 }
 0x540   :  { %2901 = vmatprep.subr.msk.mxu1 %vm1040_vm15, %v3419_v48 }
 0x543   :  { %2902 = vmatpush3.xpose.msk.msra.mxu1 %vm1040_vm15, %v3419_v48 }
 0x544   :  { %2903 = vmatprep.subr.msk.mxu1 %vm1040_vm15, %v3384_v13 }
 0x547   :  { %2904 = vmatpush3.xpose.msk.msra.mxu1 %vm1040_vm15, %v3384_v13 }
 0x54a   :  { %2906 = vmatmul.mubr.msk.f32.vlgmr.msra.gmra.mxu1 %vm1040_vm15, %v3419_v48 }
 0x54b   :  { %2908 = vmatprep.mubr.msk.f32.mxu1 %vm1040_vm15, %v3421_v49 }
 0x54e   :  { %2909 = vmatmul.mubr.msk.f32.gmra.mxu1 %vm1040_vm15, %v3435_v53 }
 0x5d6   :  { %v1020_v61 = vpop.f32.mrf.mxu1 }
 0x5d7   :  { %2828 = vmatmul.mubr.msk.f32.vlgmr.msra.gmra.mxu0 %vm1040_vm15, %v1020_v61 }
 0x5d8   :  { %v2808_v62 = vpop.f32.mrf.mxu1  ;;  %2856 = vmatprep.mubr.msk.f32.mxu0 %vm1237_vm0, %v1233_v5 }
 0x5e8   :  { %v2850_v63 = vpop.f32.mrf.mxu1 }
 0x5ea   :  { %v1214_v0 = vpop.f32.mrf.mxu1 }
 0x5ec   :  { %v2853_v1 = vpop.f32.mrf.mxu1 }
 0x5ee   :  { %v3493_v19 = vpop.f32.mrf.mxu1 }
 0x5fa   :  { %v3495_v2 = vpop.f32.mrf.mxu1 }
 0x5fc   :  { %v3497_v3 = vpop.f32.mrf.mxu1 }
 0x5fe   :  { %v3499_v21 = vpop.f32.mrf.mxu1 }
 0x5ff   :  { %2939 = vmatprep.subr.mxu1 %v3499_v21 }
 0x600   :  { %v3502_v4 = vpop.f32.mrf.mxu1  ;;  %2940 = vmatpush3.msra.mxu1 %v3499_v21 }
 0x601   :  { %2941 = vmatprep.subr.mxu1 %v3502_v4 }
 0x602   :  { %2942 = vmatpush3.msra.mxu1 %v3502_v4 }
 0x603   :  { %2943 = vmatprep.subr.mxu1 %v3495_v2 }
 0x604   :  { %2944 = vmatpush3.msra.mxu1 %v3495_v2 }
 0x605   :  { %2945 = vmatprep.subr.mxu1 %v3497_v3 }
 0x606   :  { %2946 = vmatpush3.msra.mxu1 %v3497_v3 }
 0x607   :  { %2971 = vmatprep.subr.mxu1 %v3023_v7 }
 0x60a   :  { %v2907_v16 = vpop.f32.mrf.mxu1 }
 0x60b   :  { %v1614_v43 = vmul.f32 2.0, %v2907_v16 }
 0x60c   :  { %v1594_v37 = vpop.f32.mrf.mxu1 }
 0x60d   :  { %v1613_v46 = vmul.f32 2.0, %v1594_v37 }
 0x60e   :  { %v2910_v41 = vpop.f32.mrf.mxu1 }
 0x60f   :  { %v1616_v47 = vmul.f32 2.0, %v2910_v41 }
 0x610   :  { %v1604_v42 = vpop.f32.mrf.mxu1 }
 0x611   :  { %v1615_v48 = vmul.f32 2.0, %v1604_v42 }
 0x697   :  { %v1113_v14 = vpop.f32.mrf.mxu0 }
 0x698   :  { %v1114_v8 = vadd.f32 %v2504_v6, %v1113_v14 }
 0x699   :  { %v2829_v9 = vpop.f32.mrf.mxu0 }
 0x69a   :  { %2854 = vmatprep.subr.msk.mxu0 %vm1250_vm1, %v1114_v8 }
 0x69b   :  { %2855 = vmatpush3.msk.msra.mxu0 %vm1250_vm1, %v1114_v8 }
 0x69c   :  { %2857 = vmatmul.mubr.msk.f32.vlgmr.msra.gmra.mxu0 %vm1237_vm0, %v1234_v10  ;;  %2886 = vmatprep.subr.mxu0 %v3023_v7 }
 0x69d   :  { %2887 = vmatpush3.xpose.msk.msra.mxu0 %vm1040_vm15, %v1443_v17  ;;  %2859 = vmatprep.mubr.msk.f32.mxu0 %vm1237_vm0, %v1235_v18 }
 0x69e   :  { %2888 = vmatprep.subr.mxu0 %v3023_v7 }
 0x6a0   :  { %2860 = vmatmul.mubr.msk.f32.gmra.mxu0 %vm1237_vm0, %v1236_v23 }
 0x6a1   :  { %2889 = vmatpush3.xpose.msk.msra.mxu0 %vm1040_vm15, %v1442_v24  ;;  %2894 = vmatprep.mubr.msk.f32.mxu0 %vm3024_vm2, %v3023_v7 }
 0x6a2   :  { %2890 = vmatprep.subr.mxu0 %v3023_v7 }
 0x6a5   :  { %2891 = vmatpush3.xpose.msk.msra.mxu0 %vm1040_vm15, %v1441_v25 }
 0x6a6   :  { %2892 = vmatprep.subr.mxu0 %v3023_v7 }
 0x6a9   :  { %2893 = vmatpush3.xpose.msk.msra.mxu0 %vm1040_vm15, %v1440_v26 }
 0x6aa   :  { %2911 = vmatprep.subr.mxu0 %v3499_v21 }
 0x6ac   :  { %2895 = vmatmul.mubr.msk.f32.vlgmr.msra.gmra.mxu0 %vm1040_vm15, %v3025_v11  ;;  %v2507_v11 = vld [vmem:[%s3753_s8] ss:$0 sm:$0xff] }
 0x6ad   :  { %2912 = vmatpush3.msra.mxu0 %v3499_v21  ;;  %v1220_v27 = vadd.f32 %v2850_v63, %v2507_v11  ;;  %v1215_v28 = vadd.f32 %v2507_v11, %v1214_v0  ;;  %v1230_v32 = vadd.f32 %v2853_v1, %v2507_v11  ;;  %v1225_v36 = vadd.f32 %v2507_v11, %v3493_v19 }
 0x6ae   :  { %2913 = vmatprep.subr.mxu0 %v3502_v4 }
 0x6af   :  { %2914 = vmatpush3.msra.mxu0 %v3502_v4 }
 0x6b0   :  { %2915 = vmatprep.subr.mxu0 %v3495_v2 }
 0x6b1   :  { %2916 = vmatpush3.msra.mxu0 %v3495_v2 }
 0x6b2   :  { %2917 = vmatprep.subr.mxu0 %v3497_v3 }
 0x6b3   :  { %2918 = vmatpush3.msra.mxu0 %v3497_v3 }
 0x6b4   :  { %2925 = vmatprep.subr.mxu0 %v3499_v21 }
 0x75c   :  { %v2858_v15 = vpop.f32.mrf.mxu0 }
 0x75d   :  { %v3565_v29 = vadd.f32 %v2858_v15, %v1220_v27 }
 0x75e   :  { %v1320_v30 = vpop.f32.mrf.mxu0 }
 0x75f   :  { %v3567_v33 = vadd.f32 %v1320_v30, %v1215_v28 }
 0x760   :  { %v2861_v12 = vpop.f32.mrf.mxu0 }
 0x761   :  { %v3570_v13 = vadd.f32 %v2861_v12, %v1230_v32 }
 0x762   :  { %v1330_v38 = vpop.f32.mrf.mxu0 }
 0x763   :  { %v3572_v40 = vadd.f32 %v1330_v38, %v1225_v36 }
 0x76c   :  { %v1524_v45 = vpop.f32.mrf.mxu0 }
 0x76d   :  { %v1620_v49 = vrot.slane %v1524_v45, %v453_v22 }
 0x76e   :  { %v2896_v50 = vpop.f32.mrf.mxu0 }
 0x76f   :  { %v1622_v52 = vsub.f32 %v1620_v49, %v1614_v43  ;;  %v1621_v53 = vsub.f32 %v1620_v49, %v1613_v46  ;;  %v1624_v54 = vsub.f32 %v1620_v49, %v1616_v47  ;;  %v1623_v55 = vsub.f32 %v1620_v49, %v1615_v48 }
 0x771   :  { %v1626_v56 = vadd.f32 %v1622_v52, %v3228_v35  ;;  %v1625_v57 = vadd.f32 %v1621_v53, %v3223_v31  ;;  %v1628_v60 = vadd.f32 %v1624_v54, %v3241_v44  ;;  %v1627_v61 = vadd.f32 %v1623_v55, %v3234_v39 }
 0x773   :  { %v1632_v58 = vsel %vm463_vm3, %v1626_v56, inf  ;;  %v1629_v59 = vsel %vm463_vm3, %v1625_v57, inf  ;;  %v1638_v20 = vsel %vm463_vm3, %v1628_v60, inf  ;;  %v1635_v22 = vsel %vm463_vm3, %v1627_v61, inf }
 0x774   :  { %1633 = vmin.xlane.f32.xlu1 %v1632_v58  ;;  %1630 = vmin.xlane.f32.xlu0 %v1629_v59 }
 0x778   :  { %1639 = vmin.xlane.f32.xlu1 %v1638_v20  ;;  %1636 = vmin.xlane.f32.xlu0 %v1635_v22 }
 0x7fd   :  { %v1634_v62 = vpop.xlane.xlu1 %1633  ;;  %v1631_v35 = vpop.xlane.xlu0 %1630 }
 0x7fe   :  { %vm1642_vm4 = vcmp.le.f32.partialorder %v1626_v56, %v1634_v62  ;;  %vm1641_vm5 = vcmp.le.f32.partialorder %v1625_v57, %v1631_v35 }
 0x7ff   :  { %v1646_v31 = vsel %vm1642_vm4, %v3248_v51, 32.0  ;;  %v1645_v63 = vsel %vm1641_vm5, %v3248_v51, 32.0 }
 0x800   :  { %v1652_v44 = vsel %vm463_vm3, %v1646_v31, inf  ;;  %v1649_v39 = vsel %vm463_vm3, %v1645_v63, inf }
 0x801   :  { %1653 = vmin.xlane.f32.xlu1 %v1652_v44  ;;  %v1640_v0 = vpop.xlane.xlu1 %1639  ;;  %1650 = vmin.xlane.f32.xlu0 %v1649_v39  ;;  %v1637_v1 = vpop.xlane.xlu0 %1636 }
 0x802   :  { %vm1644_vm6 = vcmp.le.f32.partialorder %v1628_v60, %v1640_v0  ;;  %vm1643_vm7 = vcmp.le.f32.partialorder %v1627_v61, %v1637_v1 }
 0x803   :  { %v1648_v19 = vsel %vm1644_vm6, %v3248_v51, 32.0  ;;  %v1647_v5 = vsel %vm1643_vm7, %v3248_v51, 32.0 }
 0x804   :  { %v1658_v6 = vsel %vm463_vm3, %v1648_v19, inf  ;;  %v1655_v14 = vsel %vm463_vm3, %v1647_v5, inf }
 0x805   :  { %1659 = vmin.xlane.f32.xlu1 %v1658_v6  ;;  %1656 = vmin.xlane.f32.xlu0 %v1655_v14 }
 0x88a   :  { %v1654_v8 = vpop.xlane.xlu1 %1653  ;;  %v1651_v9 = vpop.xlane.xlu0 %1650 }
 0x88b   :  { %vm1662_vm8 = vcmp.eq.f32.partialorder %v3248_v51, %v1654_v8  ;;  %vm1661_vm9 = vcmp.eq.f32.partialorder %v3248_v51, %v1651_v9 }
 0x88c   :  { %v2537_v10 = vsel %vm1662_vm8, 1.0, %v3023_v7  ;;  %v2536_v18 = vsel %vm1661_vm9, 1.0, %v3023_v7 }
 0x88d   :  { %v1674_v17 = vmul.f32 1e+30, %v2537_v10  ;;  %v1673_v23 = vmul.f32 1e+30, %v2536_v18  ;;  %2919 = vmatprep.mubr.msk.f32.mxu0 %vm463_vm3, %v2536_v18 }
 0x88e   :  { %v1660_v24 = vpop.xlane.xlu1 %1659  ;;  %2920 = vmatmul.mubr.msk.f32.vlgmr.msra.gmra.mxu0 %vm463_vm3, %v2537_v10  ;;  %v1657_v25 = vpop.xlane.xlu0 %1656 }
 0x88f   :  { %v1678_v26 = vadd.f32 %v1674_v17, %v1626_v56  ;;  %v3598_v11 = vadd.f32 %v1673_v23, %v1625_v57  ;;  %vm1664_vm10 = vcmp.eq.f32.partialorder %v3248_v51, %v1660_v24  ;;  %2926 = vmatpush3.msra.mxu0 %v3499_v21  ;;  %vm1663_vm11 = vcmp.eq.f32.partialorder %v3248_v51, %v1657_v25 }
 0x890   :  { %v2539_v27 = vsel %vm1664_vm10, 1.0, %v3023_v7  ;;  %v2538_v15 = vsel %vm1663_vm11, 1.0, %v3023_v7  ;;  %2927 = vmatprep.subr.mxu0 %v3502_v4 }
 0x891   :  { %v1676_v28 = vmul.f32 1e+30, %v2539_v27  ;;  %v1675_v16 = vmul.f32 1e+30, %v2538_v15  ;;  %2928 = vmatpush3.msra.mxu0 %v3502_v4  ;;  %2922 = vmatprep.mubr.msk.f32.mxu0 %vm463_vm3, %v2538_v15  ;;  %v1793_v30 = vsel %vm463_vm3, %v1678_v26, inf  ;;  %v1790_v32 = vsel %vm463_vm3, %v3598_v11, inf }
 0x892   :  { %2929 = vmatprep.subr.mxu0 %v3495_v2  ;;  %1794 = vmin.xlane.f32.xlu1 %v1793_v30 }
 0x893   :  { %v1680_v21 = vadd.f32 %v1676_v28, %v1628_v60  ;;  %v1679_v12 = vadd.f32 %v1675_v16, %v1627_v61  ;;  %2930 = vmatpush3.msra.mxu0 %v3495_v2  ;;  %1791 = vmin.xlane.f32.xlu0 %v1790_v32 }
 0x894   :  { %2923 = vmatmul.mubr.msk.f32.gmra.mxu0 %vm463_vm3, %v2539_v27  ;;  %2931 = vmatprep.subr.mxu0 %v3497_v3 }
 0x895   :  { %2932 = vmatpush3.msra.mxu0 %v3497_v3  ;;  %v1799_v4 = vsel %vm463_vm3, %v1680_v21, inf  ;;  %v1796_v36 = vsel %vm463_vm3, %v1679_v12, inf }
 0x896   :  { %1800 = vmin.xlane.f32.xlu1 %v1799_v4  ;;  %2953 = vmatprep.subr.mxu0 %v3023_v7 }
 0x897   :  { %1797 = vmin.xlane.f32.xlu0 %v1796_v36 }
 0x91b   :  { %v1795_v37 = vpop.xlane.xlu1 %1794 }
 0x91c   :  { %vm1803_vm12 = vcmp.le.f32.partialorder %v1678_v26, %v1795_v37  ;;  %v1792_v38 = vpop.xlane.xlu0 %1791 }
 0x91d   :  { %vm1802_vm13 = vcmp.le.f32.partialorder %v3598_v11, %v1792_v38  ;;  %v1807_v2 = vsel %vm1803_vm12, %v3248_v51, 32.0 }
 0x91e   :  { %v1813_v41 = vsel %vm463_vm3, %v1807_v2, inf  ;;  %v1806_v42 = vsel %vm1802_vm13, %v3248_v51, 32.0 }
 0x91f   :  { %1814 = vmin.xlane.f32.xlu1 %v1813_v41  ;;  %v1801_v3 = vpop.xlane.xlu1 %1800  ;;  %v1810_v43 = vsel %vm463_vm3, %v1806_v42, inf }
 0x920   :  { %vm1805_vm14 = vcmp.le.f32.partialorder %v1680_v21, %v1801_v3  ;;  %1811 = vmin.xlane.f32.xlu0 %v1810_v43  ;;  %v1798_v45 = vpop.xlane.xlu0 %1797 }
 0x921   :  { %vm1804_vm15 = vcmp.le.f32.partialorder %v1679_v12, %v1798_v45  ;;  %v1809_v46 = vsel %vm1805_vm14, %v3248_v51, 32.0 }
 0x922   :  { %v1819_v47 = vsel %vm463_vm3, %v1809_v46, inf  ;;  %v1808_v48 = vsel %vm1804_vm15, %v3248_v51, 32.0  ;;  %vm2183_vm15 = vcmask 130048  }
 0x923   :  { %1820 = vmin.xlane.f32.xlu1 %v1819_v47  ;;  %v1816_v49 = vsel %vm463_vm3, %v1808_v48, inf }
 0x924   :  { %1817 = vmin.xlane.f32.xlu0 %v1816_v49 }
 0x94e   :  { %v2921_v32 = vpop.f32.mrf.mxu0 }
 0x94f   :  { %v1779_v48 = vadd.f32 %v2921_v32, %v3565_v29 }
 0x9a8   :  { %v1815_v50 = vpop.xlane.xlu1 %1814 }
 0x9a9   :  { %vm1823_vm0 = vcmp.eq.f32.partialorder %v3248_v51, %v1815_v50  ;;  %v1812_v52 = vpop.xlane.xlu0 %1811 }
 0x9aa   :  { %v2545_v53 = vsel %vm1823_vm0, 1.0, %v3023_v7  ;;  %vm1822_vm4 = vcmp.eq.f32.partialorder %v3248_v51, %v1812_v52 }
 0x9ab   :  { %v1835_v54 = vmul.f32 1e+30, %v2545_v53  ;;  %v2544_v55 = vsel %vm1822_vm4, 1.0, %v3023_v7 }
 0x9ac   :  { %v1834_v56 = vmul.f32 1e+30, %v2544_v55  ;;  %2933 = vmatprep.mubr.msk.f32.mxu0 %vm463_vm3, %v2544_v55  ;;  %v1821_v57 = vpop.xlane.xlu1 %1820 }
 0x9ad   :  { %vm1825_vm5 = vcmp.eq.f32.partialorder %v3248_v51, %v1821_v57  ;;  %2934 = vmatmul.mubr.msk.f32.vlgmr.msra.gmra.mxu0 %vm463_vm3, %v2545_v53  ;;  %v1818_v58 = vpop.xlane.xlu0 %1817  ;;  %v1839_v59 = vadd.f32 %v1835_v54, %v1678_v26 }
 0x9ae   :  { %v2547_v60 = vsel %vm1825_vm5, 1.0, %v3023_v7  ;;  %vm1824_vm6 = vcmp.eq.f32.partialorder %v3248_v51, %v1818_v58  ;;  %v1838_v61 = vadd.f32 %v1834_v56, %v3598_v11 }
 0x9af   :  { %v1837_v20 = vmul.f32 1e+30, %v2547_v60  ;;  %v2546_v22 = vsel %vm1824_vm6, 1.0, %v3023_v7  ;;  %v1954_v62 = vsel %vm463_vm3, %v1839_v59, inf }
 0x9b0   :  { %v1836_v35 = vmul.f32 1e+30, %v2546_v22  ;;  %2936 = vmatprep.mubr.msk.f32.mxu0 %vm463_vm3, %v2546_v22  ;;  %1955 = vmin.xlane.f32.xlu1 %v1954_v62  ;;  %v1951_v31 = vsel %vm463_vm3, %v1838_v61, inf  ;;  %v1783_v62 = vmax.f32 %v1779_v48, 0.0 }
 0x9b1   :  { %1952 = vmin.xlane.f32.xlu0 %v1951_v31  ;;  %2937 = vmatmul.mubr.msk.f32.gmra.mxu0 %vm463_vm3, %v2547_v60  ;;  %v1841_v63 = vadd.f32 %v1837_v20, %v1680_v21  ;;  %v1759_v21 = vpop.f32.mrf.mxu0 }
 0x9b2   :  { %v1840_v44 = vadd.f32 %v1836_v35, %v1679_v12  ;;  %2961 = vmatprep.mubr.msk.f32.mxu0 %vm3024_vm2, %v3023_v7  ;;  %v1778_v56 = vadd.f32 %v1759_v21, %v3567_v33 }
 0x9b3   :  { %v1960_v39 = vsel %vm463_vm3, %v1841_v63, inf  ;;  %v2924_v12 = vpop.f32.mrf.mxu0 }
 0x9b4   :  { %1961 = vmin.xlane.f32.xlu1 %v1960_v39  ;;  %v1957_v0 = vsel %vm463_vm3, %v1840_v44, inf  ;;  %v1781_v42 = vadd.f32 %v2924_v12, %v3570_v13 }
 0x9b5   :  { %1958 = vmin.xlane.f32.xlu0 %v1957_v0  ;;  %v1769_v4 = vpop.f32.mrf.mxu0 }
 0x9b6   :  { %v1780_v43 = vadd.f32 %v1769_v4, %v3572_v40  ;;  %v1785_v52 = vmax.f32 %v1781_v42, 0.0  ;;  %v2565_v4 = vld [vmem:[%s3763_s18] ss:$0 sm:$0xff] }
 0x9b8   :  { %v1784_v57 = vmax.f32 %v1780_v43, 0.0 }
 0xa39   :  { %v1956_v1 = vpop.xlane.xlu1 %1955 }
 0xa3a   :  { %vm1964_vm7 = vcmp.le.f32.partialorder %v1839_v59, %v1956_v1  ;;  %v1953_v19 = vpop.xlane.xlu0 %1952 }
 0xa3b   :  { %vm1963_vm8 = vcmp.le.f32.partialorder %v1838_v61, %v1953_v19  ;;  %v1968_v5 = vsel %vm1964_vm7, %v3248_v51, 32.0 }
 0xa3c   :  { %v1974_v6 = vsel %vm463_vm3, %v1968_v5, inf  ;;  %v1967_v14 = vsel %vm1963_vm8, %v3248_v51, 32.0 }
 0xa3d   :  { %1975 = vmin.xlane.f32.xlu1 %v1974_v6  ;;  %v1962_v8 = vpop.xlane.xlu1 %1961  ;;  %v1971_v9 = vsel %vm463_vm3, %v1967_v14, inf  ;;  %v2174_v6 = vld [vmem:[%s3758_s13] sm:$0xff]  ;;  %v2261_v14 = vld [vmem:[%s3760_s15 + $0x18] sm:$0xff] }
 0xa3e   :  { %vm1966_vm9 = vcmp.le.f32.partialorder %v1841_v63, %v1962_v8  ;;  %1972 = vmin.xlane.f32.xlu0 %v1971_v9  ;;  %v1959_v10 = vpop.xlane.xlu0 %1958  ;;  %v2260_v9 = vld [vmem:[%s3760_s15 + $0x10] sm:$0xff] }
 0xa3f   :  { %vm1965_vm10 = vcmp.le.f32.partialorder %v1840_v44, %v1959_v10  ;;  %v1970_v18 = vsel %vm1966_vm9, %v3248_v51, 32.0  ;;  %v2259_v10 = vld [vmem:[%s3760_s15 + $0x8] sm:$0xff] }
 0xa40   :  { %v1980_v17 = vsel %vm463_vm3, %v1970_v18, inf  ;;  %v1969_v23 = vsel %vm1965_vm10, %v3248_v51, 32.0  ;;  %v2258_v18 = vld [vmem:[%s3760_s15] sm:$0xff] }
 0xa41   :  { %1981 = vmin.xlane.f32.xlu1 %v1980_v17  ;;  %v1977_v24 = vsel %vm463_vm3, %v1969_v23, inf  ;;  %v2346_v17 = vld [vmem:[%s3762_s17 + $0x18] sm:$0xff]  ;;  %v2561_v23 = vld [vmem:[%s3759_s14] ss:$0 sm:$0xff] }
 0xa42   :  { %1978 = vmin.xlane.f32.xlu0 %v1977_v24 }
 0xa6d   :  { %v2935_v36 = vpop.f32.mrf.mxu0 }
 0xa6e   :  { %v1940_v45 = vadd.f32 %v2935_v36, %v3565_v29 }
 0xa6f   :  { %v1920_v37 = vpop.f32.mrf.mxu0 }
 0xa70   :  { %v1939_v49 = vadd.f32 %v1920_v37, %v3567_v33  ;;  %v1944_v58 = vmax.f32 %v1940_v45, 0.0 }
 0xa71   :  { %v2938_v38 = vpop.f32.mrf.mxu0 }
 0xa72   :  { %v1942_v41 = vadd.f32 %v2938_v38, %v3570_v13  ;;  %v1943_v35 = vmax.f32 %v1939_v49, 0.0  ;;  %v1948_v0 = vadd.f32 %v1944_v58, %v1783_v62 }
 0xa73   :  { %v1930_v2 = vpop.f32.mrf.mxu0 }
 0xa74   :  { %v1941_v3 = vadd.f32 %v1930_v2, %v3572_v40  ;;  %v1946_v47 = vmax.f32 %v1942_v41, 0.0 }
 0xa76   :  { %v1945_v53 = vmax.f32 %v1941_v3, 0.0  ;;  %v1950_v60 = vadd.f32 %v1946_v47, %v1785_v52 }
 0xa78   :  { %v1949_v31 = vadd.f32 %v1945_v53, %v1784_v57 }
 0xac6   :  { %v1976_v25 = vpop.xlane.xlu1 %1975 }
 0xac7   :  { %vm1984_vm11 = vcmp.eq.f32.partialorder %v3248_v51, %v1976_v25  ;;  %v1973_v26 = vpop.xlane.xlu0 %1972 }
 0xac8   :  { %v2553_v11 = vsel %vm1984_vm11, 1.0, %v3023_v7  ;;  %vm1983_vm12 = vcmp.eq.f32.partialorder %v3248_v51, %v1973_v26 }
 0xac9   :  { %v2552_v27 = vsel %vm1983_vm12, 1.0, %v3023_v7 }
 0xaca   :  { %2947 = vmatprep.mubr.msk.f32.mxu1 %vm463_vm3, %v2552_v27  ;;  %v1982_v15 = vpop.xlane.xlu1 %1981  ;;  %v2345_v27 = vld [vmem:[%s3762_s17 + $0x10] sm:$0xff] }
 0xacb   :  { %vm1986_vm13 = vcmp.eq.f32.partialorder %v3248_v51, %v1982_v15  ;;  %2948 = vmatmul.mubr.msk.f32.vlgmr.msra.gmra.mxu1 %vm463_vm3, %v2553_v11  ;;  %v1979_v28 = vpop.xlane.xlu0 %1978  ;;  %v2344_v15 = vld [vmem:[%s3762_s17 + $0x8] sm:$0xff] }
 0xacc   :  { %v2555_v16 = vsel %vm1986_vm13, 1.0, %v3023_v7  ;;  %vm1985_vm14 = vcmp.eq.f32.partialorder %v3248_v51, %v1979_v28  ;;  %2972 = vmatpush3.msra.mxu1 %v2261_v14  ;;  %v2343_v28 = vld [vmem:[%s3762_s17] sm:$0xff] }
 0xacd   :  { %v2554_v30 = vsel %vm1985_vm14, 1.0, %v3023_v7  ;;  %2973 = vmatprep.subr.mxu1 %v3023_v7 }
 0xace   :  { %2950 = vmatprep.mubr.msk.f32.mxu1 %vm463_vm3, %v2554_v30  ;;  %2974 = vmatpush3.msra.mxu1 %v2260_v9 }
 0xacf   :  { %2951 = vmatmul.mubr.msk.f32.gmra.mxu1 %vm463_vm3, %v2555_v16  ;;  %2975 = vmatprep.subr.mxu1 %v3023_v7  ;;  %v2563_v16 = vld [vmem:[%s3761_s16] ss:$0 sm:$0xff]  ;;  %s3026_s16 = smov [#allocation2]  }
 0xad0   :  { %2979 = vmatprep.mubr.msk.f32.mxu1 %vm3024_vm2, %v3023_v7  ;;  %2976 = vmatpush3.msra.mxu1 %v2259_v10  ;;  %s2446_s17 = sshll.u32 %s3026_s16, 4  ;;  %s2447_s17 = int_to_ptr.vmem [resolvable:$true] %s2446_s17 }
 0xad1   :  { %2977 = vmatprep.subr.mxu1 %v3023_v7  ;;  %s3001_s18 = scalar_lea.vmem %s2447_s17, 64  ;;  %p3006_p1 = scmp.lt.s32.totalorder %s2447_s17, %s2447_s17 }
 0xad2   :  { %2978 = vmatpush3.msra.mxu1 %v2258_v18  ;;  %p3002_p0 = scmp.ne.s32.totalorder %s2447_s17, %s3001_s18  ;;  %p3007_p2 = scmp.lt.s32.totalorder %s3001_s18, %s3001_s18 }
 0xad4   :  { %p3008_p3 = por %p3007_p2, %p3006_p1 }
 0xad6   :  { %p3009_p4 = pnand %p3008_p3, %p3002_p0 }
 0xb8b   :  { %v2949_v51 = vpop.f32.mrf.mxu1 }
 0xb8c   :  { %v2093_v54 = vadd.f32 %v2949_v51, %v3565_v29  ;;  %v1782_v29 = vmax.f32 %v1778_v56, 0.0 }
 0xb8d   :  { %v2073_v46 = vpop.f32.mrf.mxu1 }
 0xb8e   :  { %v2092_v61 = vadd.f32 %v2073_v46, %v3567_v33  ;;  %v2097_v63 = vmax.f32 %v2093_v54, 0.0  ;;  %v1947_v19 = vadd.f32 %v1943_v35, %v1782_v29 }
 0xb8f   :  { %v2952_v50 = vpop.f32.mrf.mxu1 }
 0xb90   :  { %v2095_v55 = vadd.f32 %v2952_v50, %v3570_v13  ;;  %v2096_v13 = vmax.f32 %v2092_v61, 0.0  ;;  %v2101_v5 = vadd.f32 %v2097_v63, %v1948_v0 }
 0xb91   :  { %v2083_v59 = vpop.f32.mrf.mxu1 }
 0xb92   :  { %v2099_v20 = vmax.f32 %v2095_v55, 0.0  ;;  %v2094_v22 = vadd.f32 %v2083_v59, %v3572_v40  ;;  %v2100_v33 = vadd.f32 %v2096_v13, %v1947_v19  ;;  %v2175_v40 = vld [vmem:[%s3758_s13 + $0x8] sm:$0xff] }
 0xb94   :  { %v2103_v44 = vadd.f32 %v2099_v20, %v1950_v60  ;;  %v2098_v39 = vmax.f32 %v2094_v22, 0.0 }
 0xb96   :  { %v2102_v1 = vadd.f32 %v2098_v39, %v1949_v31  ;;  %2954 = vmatpush3.msra.mxu0 %v2103_v44 }
 0xb97   :  { %2955 = vmatprep.subr.mxu0 %v3023_v7 }
 0xb98   :  { %2956 = vmatpush3.msra.mxu0 %v2102_v1 }
 0xb99   :  { %2957 = vmatprep.subr.mxu0 %v3023_v7 }
 0xb9a   :  { %2958 = vmatpush3.msra.mxu0 %v2101_v5 }
 0xb9b   :  { %2959 = vmatprep.subr.mxu0 %v3023_v7 }
 0xb9c   :  { %2960 = vmatpush3.msra.mxu0 %v2100_v33 }
 0xb9d   :  { %2962 = vmatmul.mubr.msk.f32.vlgmr.msra.gmra.mxu0 %vm463_vm3, %v3375_v34  ;;  %2964 = vmatprep.subr.mxu0 %v3023_v7 }
 0xb9e   :  { %2965 = vmatpush3.msra.mxu0 %v2175_v40  ;;  %2968 = vmatprep.mubr.msk.f32.mxu0 %vm3024_vm2, %v3023_v7 }
 0xb9f   :  { %2966 = vmatprep.subr.mxu0 %v3023_v7 }
 0xba0   :  { %2967 = vmatpush3.msra.mxu0 %v2174_v6 }
 0xba1   :  { %2982 = vmatprep.subr.mxu0 %v3023_v7 }
 0xc5d   :  { %v2170_v34 = vpop.f32.mrf.mxu0 }
 0xc5e   :  { %2969 = vmatmul.mubr.msk.f32.vlgmr.msra.gmra.mxu0 %vm2183_vm15, %v2170_v34 }
 0xc5f   :  { %v2963_v8 = vpop.f32.mrf.mxu0  ;;  %2990 = vmatprep.mubr.msk.f32.mxu0 %vm3024_vm2, %v3023_v7  ;;  %2983 = vmatpush3.msra.mxu0 %v2346_v17 }
 0xc60   :  { %2984 = vmatprep.subr.mxu0 %v3023_v7 }
 0xc61   :  { %2985 = vmatpush3.msra.mxu0 %v2345_v27 }
 0xc62   :  { %2986 = vmatprep.subr.mxu0 %v3023_v7 }
 0xc63   :  { %2987 = vmatpush3.msra.mxu0 %v2344_v15 }
 0xc64   :  { %2988 = vmatprep.subr.mxu0 %v3023_v7 }
 0xc65   :  { %2989 = vmatpush3.msra.mxu0 %v2343_v28 }
 0xd1e   :  { %v2253_v24 = vpop.f32.mrf.mxu0 }
 0xd1f   :  { %v2254_v25 = vadd.f32 %v2561_v23, %v2253_v24 }
 0xd20   :  { %v2970_v26 = vpop.f32.mrf.mxu0 }
 0xd21   :  { %v2257_v11 = vmax.f32 %v2254_v25, 0.0 }
 0xd23   :  { %2980 = vmatmul.mubr.msk.f32.vlgmr.msra.gmra.mxu1 %vm463_vm3, %v2257_v11 }
 0xde3   :  { %v2338_v30 = vpop.f32.mrf.mxu1 }
 0xde4   :  { %v2339_v32 = vadd.f32 %v2563_v16, %v2338_v30 }
 0xde5   :  { %v2981_v21 = vpop.f32.mrf.mxu1 }
 0xde6   :  { %v2342_v12 = vmax.f32 %v2339_v32, 0.0 }
 0xde8   :  { %2991 = vmatmul.mubr.msk.f32.vlgmr.msra.gmra.mxu0 %vm463_vm3, %v2342_v12 }
 0xea8   :  { %v2423_v36 = vpop.f32.mrf.mxu0 }
 0xea9   :  { %v2424_v37 = vadd.f32 %v2565_v4, %v2423_v36 }
 0xeaa   :  { %v2992_v38 = vpop.f32.mrf.mxu0 }
 0xeab   :  { %v2427_v7 = vsel %vm1250_vm1, %v2424_v37, -inf }
 0xeac   :  { %2428 = vmax.xlane.f32.xlu0 %v2427_v7 }
 0xf35   :  { %v2429_v2 = vpop.xlane.xlu0 %2428 }
 0xf36   :  { %v2430_v41 = vsub.f32 %v2424_v37, %v2429_v2 }
 0xf38   :  { %v2431_v51 = vmul.f32 1.442695, %v2430_v41 }
 0xf3a   :  { %2997 = vpow2.f32 %v2431_v51 }
 0xf47   :  { %v2998_v42 = vpop.eup %2997 }
 0xf48   :  { %v2433_v3 = vsel %vm1250_vm1, %v2998_v42, 0.0 }
 0xf49   :  { %2434 = vadd.xlane.f32.xlu1 %v2433_v3 }
 0xfd2   :  { %v2435_v43 = vpop.xlane.xlu1 %2434 }
 0xfd3   :  { %2999 = vlog2.f32 %v2435_v43 }
 0xfe0   :  { %v3000_v45 = vpop.eup %2999 }
 0xfe1   :  { %v2437_v46 = vmul.f32 0.6931472, %v3000_v45 }
 0xfe3   :  { %v2438_v47 = vsub.f32 %v2430_v41, %v2437_v46 }
 0xfe5   :  { %2439 = vst [vmem:[#allocation2] sm:$0xf] %v2438_v47 }
 0xfe6   :  { %3012 = shalt.err (!%p3009_p4)
}
 0xfe7   :  { %2449 = dma.vmem_to_hbm [thread:$0]  %s2447_s17, 64, %s3764_s19, [#allocation3]  }
 0xfe8   :  { %3021 = dma.done.wait [#allocation3], 64  }
 0xfe9   :  { %3022 = vsyncadd [#allocation3], 4294967232 }
 0xfea   :  { %2453 = vsyncpa [#allocation3], 1 }

</bundles_post_ra>
